<compile_context>
chip_gen: v5e
topology: v5e:2x2
jax: 0.10.0
libtpu: 0.0.40
codegen_flags: <defaults>
</compile_context>

<pallas_src>
import functools

import numpy as np
import jax
import jax.numpy as jnp
from jax.experimental import pallas as pl
from jax.experimental.pallas import tpu as pltpu


def _round_up(x, m):
    return (x + m - 1) // m * m


def nhits_kernel(inp_ref,
                 w1_ref, b1_ref, w2_ref, b2_ref, w3_ref, b3_ref,
                 wh_ref, bh_ref,
                 out_ref,
                 *, num_blocks, in_pad):
    """One batch tile of the full NHITS block chain (statically unrolled)."""
    residual = inp_ref[...].astype(jnp.float32)
    forecast = jnp.zeros(out_ref.shape, jnp.float32)

    for k in range(num_blocks):  # inherently serial chain -> static unroll
        # fc MLP: bf16 operands on the MXU, f32 accumulation, f32 bias+ReLU.
        h = jnp.maximum(
            jnp.dot(residual.astype(jnp.bfloat16), w1_ref[k],
                    preferred_element_type=jnp.float32) + b1_ref[k], 0.0)
        h = jnp.maximum(
            jnp.dot(h.astype(jnp.bfloat16), w2_ref[k],
                    preferred_element_type=jnp.float32) + b2_ref[k], 0.0)
        h = jnp.maximum(
            jnp.dot(h.astype(jnp.bfloat16), w3_ref[k],
                    preferred_element_type=jnp.float32) + b3_ref[k], 0.0)
        h = h.astype(jnp.bfloat16)

        if k == num_blocks - 1:
            # Final residual is dead -> skip the backcast matmul entirely.
            # Static slice lands on a 128-lane boundary (in_pad % 128 == 0).
            fc = jnp.dot(h, wh_ref[k, :, in_pad:],
                         preferred_element_type=jnp.float32) + bh_ref[k, :, in_pad:]
            forecast = forecast + fc
        else:
            # Fused backcast|forecast head: one matmul, lane-dense result slab.
            head = jnp.dot(h, wh_ref[k],
                           preferred_element_type=jnp.float32) + bh_ref[k]
            residual = residual - head[:, :in_pad]
            forecast = forecast + head[:, in_pad:]

    out_ref[...] = forecast.astype(out_ref.dtype)


def pack_params(params, input_size, output_size):
    """One-time packing: pad to lane multiples, fuse the backcast|forecast
    head, cast weights to bf16 (biases stay f32). Call once, reuse per step."""
    w1, b1, w2, b2, w3, b3, wb, bb, wf, bf = params
    num_blocks, _, hidden = w1.shape
    in_pad = _round_up(input_size, 128)
    out_pad = _round_up(output_size, 128)
    hid_pad = _round_up(hidden, 128)

    def pad_to(a, shape):
        return jnp.pad(a, [(0, t - s) for s, t in zip(a.shape, shape)])

    w1p = pad_to(w1, (num_blocks, in_pad, hid_pad)).astype(jnp.bfloat16)
    w2p = pad_to(w2, (num_blocks, hid_pad, hid_pad)).astype(jnp.bfloat16)
    w3p = pad_to(w3, (num_blocks, hid_pad, hid_pad)).astype(jnp.bfloat16)
    b1p = pad_to(b1, (num_blocks, hid_pad)).reshape(num_blocks, 1, hid_pad).astype(jnp.float32)
    b2p = pad_to(b2, (num_blocks, hid_pad)).reshape(num_blocks, 1, hid_pad).astype(jnp.float32)
    b3p = pad_to(b3, (num_blocks, hid_pad)).reshape(num_blocks, 1, hid_pad).astype(jnp.float32)

    # Fused (backcast | forecast) head: (nb, hid_pad, in_pad + out_pad).
    whp = jnp.concatenate([pad_to(wb, (num_blocks, hid_pad, in_pad)),
                           pad_to(wf, (num_blocks, hid_pad, out_pad))],
                          axis=-1).astype(jnp.bfloat16)
    bhp = jnp.concatenate([pad_to(bb, (num_blocks, in_pad)),
                           pad_to(bf, (num_blocks, out_pad))],
                          axis=-1).reshape(num_blocks, 1, in_pad + out_pad).astype(jnp.float32)

    return dict(w1=w1p, b1=b1p, w2=w2p, b2=b2p, w3=w3p, b3=b3p, wh=whp, bh=bhp,
                num_blocks=num_blocks, in_pad=in_pad, out_pad=out_pad,
                hid_pad=hid_pad)


def _pick_batch_tile(bsz):
    if bsz >= 512:
        return 256          # fill the 256-wide MXU M dim on v6e/v7x
    if bsz >= 256:
        return 128          # >= 2 grid steps (v7x dual-TC), MXU-reasonable
    if bsz > 16:
        # small batch: still aim for >= 2 grid steps so both v7x cores work
        return max(_round_up(_round_up(bsz, 8) // 2, 8), 8)
    return _round_up(max(bsz, 1), 8)


def nhits_forward(x, packed, input_size, output_size, *, batch_tile=None):
    """x: (batch, seq_len, features). Returns forecast (batch, output_size)."""
    bsz = x.shape[0]
    # Glue in plain JAX (matches: x[:, -input_size:, 0].reshape(bsz, -1)).
    inp = x[:, -input_size:, 0].reshape(bsz, input_size)

    num_blocks = packed["num_blocks"]
    in_pad, out_pad, hid_pad = packed["in_pad"], packed["out_pad"], packed["hid_pad"]

    tb = batch_tile if batch_tile is not None else _pick_batch_tile(bsz)
    bsz_pad = _round_up(bsz, tb)
    inp_p = jnp.pad(inp.astype(jnp.float32),
                    ((0, bsz_pad - bsz), (0, in_pad - input_size)))

    kernel = functools.partial(nhits_kernel,
                               num_blocks=num_blocks, in_pad=in_pad)

    bmap = lambda i: (i, 0)          # batch-tiled arrays
    wmap3 = lambda i: (0, 0, 0)      # whole stacked weights, DMA'd once

    def wspec(shape):                # constant index -> single-buffered
        return pl.BlockSpec(shape, wmap3, pipeline_mode=pl.Buffered(1))

    weights = (packed["w1"], packed["b1"], packed["w2"], packed["b2"],
               packed["w3"], packed["b3"], packed["wh"], packed["bh"])
    weight_bytes = int(sum(int(np.prod(a.shape)) * a.dtype.itemsize
                           for a in weights))

    # Explicit VMEM budget: single-buffered weights + double-buffered I/O
    # tiles + activation headroom; capped below v7x's 64 MiB physical VMEM.
    io_bytes = 2 * 2 * tb * (in_pad + out_pad) * 4
    act_bytes = 8 * tb * max(hid_pad, in_pad + out_pad) * 4
    vmem_limit = int(min(60 << 20,
                         max(32 << 20,
                             weight_bytes + io_bytes + act_bytes + (4 << 20))))

    # Cost hint so XLA schedules neighbors around the custom call.
    flops_row = 0
    for k in range(num_blocks):
        head_n = (in_pad + out_pad) if k < num_blocks - 1 else out_pad
        flops_row += 2 * (in_pad * hid_pad + 2 * hid_pad * hid_pad + hid_pad * head_n)
    cost = pl.CostEstimate(
        flops=int(flops_row * bsz_pad),
        transcendentals=0,
        bytes_accessed=int(weight_bytes + inp_p.size * 4 + bsz_pad * out_pad * 4))

    out = pl.pallas_call(
        kernel,
        out_shape=jax.ShapeDtypeStruct((bsz_pad, out_pad), jnp.float32),
        grid=(bsz_pad // tb,),
        in_specs=[
            pl.BlockSpec((tb, in_pad), bmap),                        # inp
            wspec((num_blocks, in_pad, hid_pad)),                    # W1
            wspec((num_blocks, 1, hid_pad)),                         # b1
            wspec((num_blocks, hid_pad, hid_pad)),                   # W2
            wspec((num_blocks, 1, hid_pad)),                         # b2
            wspec((num_blocks, hid_pad, hid_pad)),                   # W3
            wspec((num_blocks, 1, hid_pad)),                         # b3
            wspec((num_blocks, hid_pad, in_pad + out_pad)),          # Wb|Wf
            wspec((num_blocks, 1, in_pad + out_pad)),                # bb|bf
        ],
        out_specs=pl.BlockSpec((tb, out_pad), bmap),
        compiler_params=pltpu.CompilerParams(
            dimension_semantics=("parallel",),
            vmem_limit_bytes=vmem_limit),
        cost_estimate=cost,
    )(inp_p, *weights)

    return out[:bsz, :output_size].astype(x.dtype)


def init_params(key, input_size, output_size, hidden_size, num_blocks):
    """Deterministic init mimicking nn.Linear's U(-1/sqrt(fan_in), 1/sqrt(fan_in)).

    Weights are stored as (num_blocks, fan_in, fan_out) so the kernel does
    x @ W (equivalent to PyTorch's x @ W.T with W of shape (out, in))."""
    keys = jax.random.split(key, 5)

    def lin(k, fan_in, fan_out):
        bound = 1.0 / float(np.sqrt(fan_in))
        kw, kb = jax.random.split(k)
        w = jax.random.uniform(kw, (num_blocks, fan_in, fan_out),
                               jnp.float32, -bound, bound)
        b = jax.random.uniform(kb, (num_blocks, fan_out),
                               jnp.float32, -bound, bound)
        return w, b

    w1, b1 = lin(keys[0], input_size, hidden_size)
    w2, b2 = lin(keys[1], hidden_size, hidden_size)
    w3, b3 = lin(keys[2], hidden_size, hidden_size)
    wb, bb = lin(keys[3], hidden_size, input_size)    # backcast head
    wf, bf = lin(keys[4], hidden_size, output_size)   # forecast head
    return (w1, b1, w2, b2, w3, b3, wb, bb, wf, bf)


def nhits_reference(x, params, input_size, output_size, *, bf16_matmul=True):
    """Pure-JAX reference of the PyTorch forward. With bf16_matmul=True the
    matmuls mimic the kernel's bf16-operand / f32-accumulate arithmetic."""
    bsz = x.shape[0]
    inp = x[:, -input_size:, 0].reshape(bsz, input_size)
    w1, b1, w2, b2, w3, b3, wb, bb, wf, bf = params

    def mm(a, w):
        if bf16_matmul:
            return jnp.dot(a.astype(jnp.bfloat16), w.astype(jnp.bfloat16),
                           preferred_element_type=jnp.float32)
        return jnp.dot(a, w, preferred_element_type=jnp.float32)

    residual = inp.astype(jnp.float32)
    forecast = jnp.zeros((bsz, output_size), jnp.float32)
    for k in range(w1.shape[0]):
        h = jax.nn.relu(mm(residual, w1[k]) + b1[k])
        h = jax.nn.relu(mm(h, w2[k]) + b2[k])
        h = jax.nn.relu(mm(h, w3[k]) + b3[k])
        bc = mm(h, wb[k]) + bb[k]
        fc = mm(h, wf[k]) + bf[k]
        residual = residual - bc
        forecast = forecast + fc
    return forecast


if __name__ == "__main__":
    input_size = 8      # lookback window used by the model
    output_size = 4     # forecast horizon
    hidden_size = 32
    num_blocks = 4
    bsz, seq_len, features = 4, 16, 3

    key = jax.random.PRNGKey(0)
    kx, kp = jax.random.split(key)
    x = jax.random.normal(kx, (bsz, seq_len, features), jnp.float32)
    params = init_params(kp, input_size, output_size, hidden_size, num_blocks)

    packed = pack_params(params, input_size, output_size)   # one-time packing
    out = nhits_forward(x, packed, input_size, output_size)
    out = jax.block_until_ready(out)

    # Tight parity against a reference that mimics the kernel's bf16 matmul...
    ref_bf16 = nhits_reference(x, params, input_size, output_size,
                               bf16_matmul=True)
    np.testing.assert_allclose(np.asarray(out), np.asarray(ref_bf16),
                               rtol=2e-3, atol=2e-3)
    # ...and a looser sanity check against the pure-f32 PyTorch-equivalent.
    ref_f32 = nhits_reference(x, params, input_size, output_size,
                              bf16_matmul=False)
    np.testing.assert_allclose(np.asarray(out), np.asarray(ref_f32),
                               rtol=5e-2, atol=5e-2)
    print("KERNEL_OK")
</pallas_src>

<mosaic_0001>
module attributes {stable_mosaic.version = 11 : i64} {
  func.func @nhits_kernel(%arg0: i32, %arg1: memref<8x128xf32, #tpu.memory_space<vmem>>, %arg2: memref<4x128x128xbf16, #tpu.memory_space<vmem>>, %arg3: memref<4x1x128xf32, #tpu.memory_space<vmem>>, %arg4: memref<4x128x128xbf16, #tpu.memory_space<vmem>>, %arg5: memref<4x1x128xf32, #tpu.memory_space<vmem>>, %arg6: memref<4x128x128xbf16, #tpu.memory_space<vmem>>, %arg7: memref<4x1x128xf32, #tpu.memory_space<vmem>>, %arg8: memref<4x128x256xbf16, #tpu.memory_space<vmem>>, %arg9: memref<4x1x256xf32, #tpu.memory_space<vmem>>, %arg10: memref<8x128xf32, #tpu.memory_space<vmem>>) attributes {dimension_semantics = [#tpu.dimension_semantics<parallel>], iteration_bounds = array<i64: 1>, scalar_prefetch = 0 : i64, scratch_operands = 0 : i64, tpu.core_type = #tpu.core_type<tc>, window_params = [{transform_indices = @transform_0, window_bounds = array<i64: 8, 128>}, {pipeline_mode = #tpu.pipeline_mode<synchronous>, transform_indices = @transform_1, window_bounds = array<i64: 4, 128, 128>}, {pipeline_mode = #tpu.pipeline_mode<synchronous>, transform_indices = @transform_2, window_bounds = array<i64: 4, 1, 128>}, {pipeline_mode = #tpu.pipeline_mode<synchronous>, transform_indices = @transform_3, window_bounds = array<i64: 4, 128, 128>}, {pipeline_mode = #tpu.pipeline_mode<synchronous>, transform_indices = @transform_4, window_bounds = array<i64: 4, 1, 128>}, {pipeline_mode = #tpu.pipeline_mode<synchronous>, transform_indices = @transform_5, window_bounds = array<i64: 4, 128, 128>}, {pipeline_mode = #tpu.pipeline_mode<synchronous>, transform_indices = @transform_6, window_bounds = array<i64: 4, 1, 128>}, {pipeline_mode = #tpu.pipeline_mode<synchronous>, transform_indices = @transform_7, window_bounds = array<i64: 4, 128, 256>}, {pipeline_mode = #tpu.pipeline_mode<synchronous>, transform_indices = @transform_8, window_bounds = array<i64: 4, 1, 256>}, {transform_indices = @transform_9, window_bounds = array<i64: 8, 128>}]} {
    %c0 = arith.constant 0 : index
    %c0_0 = arith.constant 0 : index
    %0 = vector.load %arg1[%c0, %c0_0] : memref<8x128xf32, #tpu.memory_space<vmem>>, vector<8x128xf32>
    %cst = arith.constant 0.000000e+00 : f32
    %1 = vector.broadcast %cst : f32 to vector<8x128xf32>
    %2 = arith.truncf %0 : vector<8x128xf32> to vector<8x128xbf16>
    %c0_1 = arith.constant 0 : index
    %c0_2 = arith.constant 0 : index
    %c0_3 = arith.constant 0 : index
    %3 = vector.load %arg2[%c0_1, %c0_2, %c0_3] : memref<4x128x128xbf16, #tpu.memory_space<vmem>>, vector<1x128x128xbf16>
    %4 = vector.shape_cast %3 : vector<1x128x128xbf16> to vector<128x128xbf16>
    %cst_4 = arith.constant dense<0.000000e+00> : vector<8x128xf32>
    %5 = tpu.matmul %2, %4, %cst_4 {dimension_numbers = #tpu.dot_dimension_numbers<[1], [0], [0], [1], [0, 0, 1, 1], [], []>} : vector<8x128xbf16>, vector<128x128xbf16>, vector<8x128xf32> -> vector<8x128xf32>
    %c0_5 = arith.constant 0 : index
    %c0_6 = arith.constant 0 : index
    %c0_7 = arith.constant 0 : index
    %6 = vector.load %arg3[%c0_5, %c0_6, %c0_7] : memref<4x1x128xf32, #tpu.memory_space<vmem>>, vector<1x1x128xf32>
    %7 = vector.shape_cast %6 : vector<1x1x128xf32> to vector<1x128xf32>
    %8 = vector.broadcast %7 : vector<1x128xf32> to vector<8x128xf32>
    %9 = arith.addf %5, %8 : vector<8x128xf32>
    %cst_8 = arith.constant 0.000000e+00 : f32
    %10 = vector.broadcast %cst_8 : f32 to vector<8x128xf32>
    %11 = arith.maximumf %9, %10 : vector<8x128xf32>
    %12 = arith.truncf %11 : vector<8x128xf32> to vector<8x128xbf16>
    %c0_9 = arith.constant 0 : index
    %c0_10 = arith.constant 0 : index
    %c0_11 = arith.constant 0 : index
    %13 = vector.load %arg4[%c0_9, %c0_10, %c0_11] : memref<4x128x128xbf16, #tpu.memory_space<vmem>>, vector<1x128x128xbf16>
    %14 = vector.shape_cast %13 : vector<1x128x128xbf16> to vector<128x128xbf16>
    %cst_12 = arith.constant dense<0.000000e+00> : vector<8x128xf32>
    %15 = tpu.matmul %12, %14, %cst_12 {dimension_numbers = #tpu.dot_dimension_numbers<[1], [0], [0], [1], [0, 0, 1, 1], [], []>} : vector<8x128xbf16>, vector<128x128xbf16>, vector<8x128xf32> -> vector<8x128xf32>
    %c0_13 = arith.constant 0 : index
    %c0_14 = arith.constant 0 : index
    %c0_15 = arith.constant 0 : index
    %16 = vector.load %arg5[%c0_13, %c0_14, %c0_15] : memref<4x1x128xf32, #tpu.memory_space<vmem>>, vector<1x1x128xf32>
    %17 = vector.shape_cast %16 : vector<1x1x128xf32> to vector<1x128xf32>
    %18 = vector.broadcast %17 : vector<1x128xf32> to vector<8x128xf32>
    %19 = arith.addf %15, %18 : vector<8x128xf32>
    %cst_16 = arith.constant 0.000000e+00 : f32
    %20 = vector.broadcast %cst_16 : f32 to vector<8x128xf32>
    %21 = arith.maximumf %19, %20 : vector<8x128xf32>
    %22 = arith.truncf %21 : vector<8x128xf32> to vector<8x128xbf16>
    %c0_17 = arith.constant 0 : index
    %c0_18 = arith.constant 0 : index
    %c0_19 = arith.constant 0 : index
    %23 = vector.load %arg6[%c0_17, %c0_18, %c0_19] : memref<4x128x128xbf16, #tpu.memory_space<vmem>>, vector<1x128x128xbf16>
    %24 = vector.shape_cast %23 : vector<1x128x128xbf16> to vector<128x128xbf16>
    %cst_20 = arith.constant dense<0.000000e+00> : vector<8x128xf32>
    %25 = tpu.matmul %22, %24, %cst_20 {dimension_numbers = #tpu.dot_dimension_numbers<[1], [0], [0], [1], [0, 0, 1, 1], [], []>} : vector<8x128xbf16>, vector<128x128xbf16>, vector<8x128xf32> -> vector<8x128xf32>
    %c0_21 = arith.constant 0 : index
    %c0_22 = arith.constant 0 : index
    %c0_23 = arith.constant 0 : index
    %26 = vector.load %arg7[%c0_21, %c0_22, %c0_23] : memref<4x1x128xf32, #tpu.memory_space<vmem>>, vector<1x1x128xf32>
    %27 = vector.shape_cast %26 : vector<1x1x128xf32> to vector<1x128xf32>
    %28 = vector.broadcast %27 : vector<1x128xf32> to vector<8x128xf32>
    %29 = arith.addf %25, %28 : vector<8x128xf32>
    %cst_24 = arith.constant 0.000000e+00 : f32
    %30 = vector.broadcast %cst_24 : f32 to vector<8x128xf32>
    %31 = arith.maximumf %29, %30 : vector<8x128xf32>
    %32 = arith.truncf %31 : vector<8x128xf32> to vector<8x128xbf16>
    %c0_25 = arith.constant 0 : index
    %c0_26 = arith.constant 0 : index
    %c0_27 = arith.constant 0 : index
    %33 = vector.load %arg8[%c0_25, %c0_26, %c0_27] : memref<4x128x256xbf16, #tpu.memory_space<vmem>>, vector<1x128x256xbf16>
    %34 = vector.shape_cast %33 : vector<1x128x256xbf16> to vector<128x256xbf16>
    %cst_28 = arith.constant dense<0.000000e+00> : vector<8x256xf32>
    %35 = tpu.matmul %32, %34, %cst_28 {dimension_numbers = #tpu.dot_dimension_numbers<[1], [0], [0], [1], [0, 0, 1, 1], [], []>} : vector<8x128xbf16>, vector<128x256xbf16>, vector<8x256xf32> -> vector<8x256xf32>
    %c0_29 = arith.constant 0 : index
    %c0_30 = arith.constant 0 : index
    %c0_31 = arith.constant 0 : index
    %36 = vector.load %arg9[%c0_29, %c0_30, %c0_31] : memref<4x1x256xf32, #tpu.memory_space<vmem>>, vector<1x1x256xf32>
    %37 = vector.shape_cast %36 : vector<1x1x256xf32> to vector<1x256xf32>
    %38 = vector.broadcast %37 : vector<1x256xf32> to vector<8x256xf32>
    %39 = arith.addf %35, %38 : vector<8x256xf32>
    %40 = vector.extract_strided_slice %39 {offsets = [0, 0], sizes = [8, 128], strides = [1, 1]} : vector<8x256xf32> to vector<8x128xf32>
    %41 = arith.subf %0, %40 : vector<8x128xf32>
    %42 = vector.extract_strided_slice %39 {offsets = [0, 128], sizes = [8, 128], strides = [1, 1]} : vector<8x256xf32> to vector<8x128xf32>
    %43 = arith.addf %1, %42 : vector<8x128xf32>
    %44 = arith.truncf %41 : vector<8x128xf32> to vector<8x128xbf16>
    %c1 = arith.constant 1 : index
    %c0_32 = arith.constant 0 : index
    %c0_33 = arith.constant 0 : index
    %45 = vector.load %arg2[%c1, %c0_32, %c0_33] : memref<4x128x128xbf16, #tpu.memory_space<vmem>>, vector<1x128x128xbf16>
    %46 = vector.shape_cast %45 : vector<1x128x128xbf16> to vector<128x128xbf16>
    %cst_34 = arith.constant dense<0.000000e+00> : vector<8x128xf32>
    %47 = tpu.matmul %44, %46, %cst_34 {dimension_numbers = #tpu.dot_dimension_numbers<[1], [0], [0], [1], [0, 0, 1, 1], [], []>} : vector<8x128xbf16>, vector<128x128xbf16>, vector<8x128xf32> -> vector<8x128xf32>
    %c1_35 = arith.constant 1 : index
    %c0_36 = arith.constant 0 : index
    %c0_37 = arith.constant 0 : index
    %48 = vector.load %arg3[%c1_35, %c0_36, %c0_37] : memref<4x1x128xf32, #tpu.memory_space<vmem>>, vector<1x1x128xf32>
    %49 = vector.shape_cast %48 : vector<1x1x128xf32> to vector<1x128xf32>
    %50 = vector.broadcast %49 : vector<1x128xf32> to vector<8x128xf32>
    %51 = arith.addf %47, %50 : vector<8x128xf32>
    %cst_38 = arith.constant 0.000000e+00 : f32
    %52 = vector.broadcast %cst_38 : f32 to vector<8x128xf32>
    %53 = arith.maximumf %51, %52 : vector<8x128xf32>
    %54 = arith.truncf %53 : vector<8x128xf32> to vector<8x128xbf16>
    %c1_39 = arith.constant 1 : index
    %c0_40 = arith.constant 0 : index
    %c0_41 = arith.constant 0 : index
    %55 = vector.load %arg4[%c1_39, %c0_40, %c0_41] : memref<4x128x128xbf16, #tpu.memory_space<vmem>>, vector<1x128x128xbf16>
    %56 = vector.shape_cast %55 : vector<1x128x128xbf16> to vector<128x128xbf16>
    %cst_42 = arith.constant dense<0.000000e+00> : vector<8x128xf32>
    %57 = tpu.matmul %54, %56, %cst_42 {dimension_numbers = #tpu.dot_dimension_numbers<[1], [0], [0], [1], [0, 0, 1, 1], [], []>} : vector<8x128xbf16>, vector<128x128xbf16>, vector<8x128xf32> -> vector<8x128xf32>
    %c1_43 = arith.constant 1 : index
    %c0_44 = arith.constant 0 : index
    %c0_45 = arith.constant 0 : index
    %58 = vector.load %arg5[%c1_43, %c0_44, %c0_45] : memref<4x1x128xf32, #tpu.memory_space<vmem>>, vector<1x1x128xf32>
    %59 = vector.shape_cast %58 : vector<1x1x128xf32> to vector<1x128xf32>
    %60 = vector.broadcast %59 : vector<1x128xf32> to vector<8x128xf32>
    %61 = arith.addf %57, %60 : vector<8x128xf32>
    %cst_46 = arith.constant 0.000000e+00 : f32
    %62 = vector.broadcast %cst_46 : f32 to vector<8x128xf32>
    %63 = arith.maximumf %61, %62 : vector<8x128xf32>
    %64 = arith.truncf %63 : vector<8x128xf32> to vector<8x128xbf16>
    %c1_47 = arith.constant 1 : index
    %c0_48 = arith.constant 0 : index
    %c0_49 = arith.constant 0 : index
    %65 = vector.load %arg6[%c1_47, %c0_48, %c0_49] : memref<4x128x128xbf16, #tpu.memory_space<vmem>>, vector<1x128x128xbf16>
    %66 = vector.shape_cast %65 : vector<1x128x128xbf16> to vector<128x128xbf16>
    %cst_50 = arith.constant dense<0.000000e+00> : vector<8x128xf32>
    %67 = tpu.matmul %64, %66, %cst_50 {dimension_numbers = #tpu.dot_dimension_numbers<[1], [0], [0], [1], [0, 0, 1, 1], [], []>} : vector<8x128xbf16>, vector<128x128xbf16>, vector<8x128xf32> -> vector<8x128xf32>
    %c1_51 = arith.constant 1 : index
    %c0_52 = arith.constant 0 : index
    %c0_53 = arith.constant 0 : index
    %68 = vector.load %arg7[%c1_51, %c0_52, %c0_53] : memref<4x1x128xf32, #tpu.memory_space<vmem>>, vector<1x1x128xf32>
    %69 = vector.shape_cast %68 : vector<1x1x128xf32> to vector<1x128xf32>
    %70 = vector.broadcast %69 : vector<1x128xf32> to vector<8x128xf32>
    %71 = arith.addf %67, %70 : vector<8x128xf32>
    %cst_54 = arith.constant 0.000000e+00 : f32
    %72 = vector.broadcast %cst_54 : f32 to vector<8x128xf32>
    %73 = arith.maximumf %71, %72 : vector<8x128xf32>
    %74 = arith.truncf %73 : vector<8x128xf32> to vector<8x128xbf16>
    %c1_55 = arith.constant 1 : index
    %c0_56 = arith.constant 0 : index
    %c0_57 = arith.constant 0 : index
    %75 = vector.load %arg8[%c1_55, %c0_56, %c0_57] : memref<4x128x256xbf16, #tpu.memory_space<vmem>>, vector<1x128x256xbf16>
    %76 = vector.shape_cast %75 : vector<1x128x256xbf16> to vector<128x256xbf16>
    %cst_58 = arith.constant dense<0.000000e+00> : vector<8x256xf32>
    %77 = tpu.matmul %74, %76, %cst_58 {dimension_numbers = #tpu.dot_dimension_numbers<[1], [0], [0], [1], [0, 0, 1, 1], [], []>} : vector<8x128xbf16>, vector<128x256xbf16>, vector<8x256xf32> -> vector<8x256xf32>
    %c1_59 = arith.constant 1 : index
    %c0_60 = arith.constant 0 : index
    %c0_61 = arith.constant 0 : index
    %78 = vector.load %arg9[%c1_59, %c0_60, %c0_61] : memref<4x1x256xf32, #tpu.memory_space<vmem>>, vector<1x1x256xf32>
    %79 = vector.shape_cast %78 : vector<1x1x256xf32> to vector<1x256xf32>
    %80 = vector.broadcast %79 : vector<1x256xf32> to vector<8x256xf32>
    %81 = arith.addf %77, %80 : vector<8x256xf32>
    %82 = vector.extract_strided_slice %81 {offsets = [0, 0], sizes = [8, 128], strides = [1, 1]} : vector<8x256xf32> to vector<8x128xf32>
    %83 = arith.subf %41, %82 : vector<8x128xf32>
    %84 = vector.extract_strided_slice %81 {offsets = [0, 128], sizes = [8, 128], strides = [1, 1]} : vector<8x256xf32> to vector<8x128xf32>
    %85 = arith.addf %43, %84 : vector<8x128xf32>
    %86 = arith.truncf %83 : vector<8x128xf32> to vector<8x128xbf16>
    %c2 = arith.constant 2 : index
    %c0_62 = arith.constant 0 : index
    %c0_63 = arith.constant 0 : index
    %87 = vector.load %arg2[%c2, %c0_62, %c0_63] : memref<4x128x128xbf16, #tpu.memory_space<vmem>>, vector<1x128x128xbf16>
    %88 = vector.shape_cast %87 : vector<1x128x128xbf16> to vector<128x128xbf16>
    %cst_64 = arith.constant dense<0.000000e+00> : vector<8x128xf32>
    %89 = tpu.matmul %86, %88, %cst_64 {dimension_numbers = #tpu.dot_dimension_numbers<[1], [0], [0], [1], [0, 0, 1, 1], [], []>} : vector<8x128xbf16>, vector<128x128xbf16>, vector<8x128xf32> -> vector<8x128xf32>
    %c2_65 = arith.constant 2 : index
    %c0_66 = arith.constant 0 : index
    %c0_67 = arith.constant 0 : index
    %90 = vector.load %arg3[%c2_65, %c0_66, %c0_67] : memref<4x1x128xf32, #tpu.memory_space<vmem>>, vector<1x1x128xf32>
    %91 = vector.shape_cast %90 : vector<1x1x128xf32> to vector<1x128xf32>
    %92 = vector.broadcast %91 : vector<1x128xf32> to vector<8x128xf32>
    %93 = arith.addf %89, %92 : vector<8x128xf32>
    %cst_68 = arith.constant 0.000000e+00 : f32
    %94 = vector.broadcast %cst_68 : f32 to vector<8x128xf32>
    %95 = arith.maximumf %93, %94 : vector<8x128xf32>
    %96 = arith.truncf %95 : vector<8x128xf32> to vector<8x128xbf16>
    %c2_69 = arith.constant 2 : index
    %c0_70 = arith.constant 0 : index
    %c0_71 = arith.constant 0 : index
    %97 = vector.load %arg4[%c2_69, %c0_70, %c0_71] : memref<4x128x128xbf16, #tpu.memory_space<vmem>>, vector<1x128x128xbf16>
    %98 = vector.shape_cast %97 : vector<1x128x128xbf16> to vector<128x128xbf16>
    %cst_72 = arith.constant dense<0.000000e+00> : vector<8x128xf32>
    %99 = tpu.matmul %96, %98, %cst_72 {dimension_numbers = #tpu.dot_dimension_numbers<[1], [0], [0], [1], [0, 0, 1, 1], [], []>} : vector<8x128xbf16>, vector<128x128xbf16>, vector<8x128xf32> -> vector<8x128xf32>
    %c2_73 = arith.constant 2 : index
    %c0_74 = arith.constant 0 : index
    %c0_75 = arith.constant 0 : index
    %100 = vector.load %arg5[%c2_73, %c0_74, %c0_75] : memref<4x1x128xf32, #tpu.memory_space<vmem>>, vector<1x1x128xf32>
    %101 = vector.shape_cast %100 : vector<1x1x128xf32> to vector<1x128xf32>
    %102 = vector.broadcast %101 : vector<1x128xf32> to vector<8x128xf32>
    %103 = arith.addf %99, %102 : vector<8x128xf32>
    %cst_76 = arith.constant 0.000000e+00 : f32
    %104 = vector.broadcast %cst_76 : f32 to vector<8x128xf32>
    %105 = arith.maximumf %103, %104 : vector<8x128xf32>
    %106 = arith.truncf %105 : vector<8x128xf32> to vector<8x128xbf16>
    %c2_77 = arith.constant 2 : index
    %c0_78 = arith.constant 0 : index
    %c0_79 = arith.constant 0 : index
    %107 = vector.load %arg6[%c2_77, %c0_78, %c0_79] : memref<4x128x128xbf16, #tpu.memory_space<vmem>>, vector<1x128x128xbf16>
    %108 = vector.shape_cast %107 : vector<1x128x128xbf16> to vector<128x128xbf16>
    %cst_80 = arith.constant dense<0.000000e+00> : vector<8x128xf32>
    %109 = tpu.matmul %106, %108, %cst_80 {dimension_numbers = #tpu.dot_dimension_numbers<[1], [0], [0], [1], [0, 0, 1, 1], [], []>} : vector<8x128xbf16>, vector<128x128xbf16>, vector<8x128xf32> -> vector<8x128xf32>
    %c2_81 = arith.constant 2 : index
    %c0_82 = arith.constant 0 : index
    %c0_83 = arith.constant 0 : index
    %110 = vector.load %arg7[%c2_81, %c0_82, %c0_83] : memref<4x1x128xf32, #tpu.memory_space<vmem>>, vector<1x1x128xf32>
    %111 = vector.shape_cast %110 : vector<1x1x128xf32> to vector<1x128xf32>
    %112 = vector.broadcast %111 : vector<1x128xf32> to vector<8x128xf32>
    %113 = arith.addf %109, %112 : vector<8x128xf32>
    %cst_84 = arith.constant 0.000000e+00 : f32
    %114 = vector.broadcast %cst_84 : f32 to vector<8x128xf32>
    %115 = arith.maximumf %113, %114 : vector<8x128xf32>
    %116 = arith.truncf %115 : vector<8x128xf32> to vector<8x128xbf16>
    %c2_85 = arith.constant 2 : index
    %c0_86 = arith.constant 0 : index
    %c0_87 = arith.constant 0 : index
    %117 = vector.load %arg8[%c2_85, %c0_86, %c0_87] : memref<4x128x256xbf16, #tpu.memory_space<vmem>>, vector<1x128x256xbf16>
    %118 = vector.shape_cast %117 : vector<1x128x256xbf16> to vector<128x256xbf16>
    %cst_88 = arith.constant dense<0.000000e+00> : vector<8x256xf32>
    %119 = tpu.matmul %116, %118, %cst_88 {dimension_numbers = #tpu.dot_dimension_numbers<[1], [0], [0], [1], [0, 0, 1, 1], [], []>} : vector<8x128xbf16>, vector<128x256xbf16>, vector<8x256xf32> -> vector<8x256xf32>
    %c2_89 = arith.constant 2 : index
    %c0_90 = arith.constant 0 : index
    %c0_91 = arith.constant 0 : index
    %120 = vector.load %arg9[%c2_89, %c0_90, %c0_91] : memref<4x1x256xf32, #tpu.memory_space<vmem>>, vector<1x1x256xf32>
    %121 = vector.shape_cast %120 : vector<1x1x256xf32> to vector<1x256xf32>
    %122 = vector.broadcast %121 : vector<1x256xf32> to vector<8x256xf32>
    %123 = arith.addf %119, %122 : vector<8x256xf32>
    %124 = vector.extract_strided_slice %123 {offsets = [0, 0], sizes = [8, 128], strides = [1, 1]} : vector<8x256xf32> to vector<8x128xf32>
    %125 = arith.subf %83, %124 : vector<8x128xf32>
    %126 = vector.extract_strided_slice %123 {offsets = [0, 128], sizes = [8, 128], strides = [1, 1]} : vector<8x256xf32> to vector<8x128xf32>
    %127 = arith.addf %85, %126 : vector<8x128xf32>
    %128 = arith.truncf %125 : vector<8x128xf32> to vector<8x128xbf16>
    %c3 = arith.constant 3 : index
    %c0_92 = arith.constant 0 : index
    %c0_93 = arith.constant 0 : index
    %129 = vector.load %arg2[%c3, %c0_92, %c0_93] : memref<4x128x128xbf16, #tpu.memory_space<vmem>>, vector<1x128x128xbf16>
    %130 = vector.shape_cast %129 : vector<1x128x128xbf16> to vector<128x128xbf16>
    %cst_94 = arith.constant dense<0.000000e+00> : vector<8x128xf32>
    %131 = tpu.matmul %128, %130, %cst_94 {dimension_numbers = #tpu.dot_dimension_numbers<[1], [0], [0], [1], [0, 0, 1, 1], [], []>} : vector<8x128xbf16>, vector<128x128xbf16>, vector<8x128xf32> -> vector<8x128xf32>
    %c3_95 = arith.constant 3 : index
    %c0_96 = arith.constant 0 : index
    %c0_97 = arith.constant 0 : index
    %132 = vector.load %arg3[%c3_95, %c0_96, %c0_97] : memref<4x1x128xf32, #tpu.memory_space<vmem>>, vector<1x1x128xf32>
    %133 = vector.shape_cast %132 : vector<1x1x128xf32> to vector<1x128xf32>
    %134 = vector.broadcast %133 : vector<1x128xf32> to vector<8x128xf32>
    %135 = arith.addf %131, %134 : vector<8x128xf32>
    %cst_98 = arith.constant 0.000000e+00 : f32
    %136 = vector.broadcast %cst_98 : f32 to vector<8x128xf32>
    %137 = arith.maximumf %135, %136 : vector<8x128xf32>
    %138 = arith.truncf %137 : vector<8x128xf32> to vector<8x128xbf16>
    %c3_99 = arith.constant 3 : index
    %c0_100 = arith.constant 0 : index
    %c0_101 = arith.constant 0 : index
    %139 = vector.load %arg4[%c3_99, %c0_100, %c0_101] : memref<4x128x128xbf16, #tpu.memory_space<vmem>>, vector<1x128x128xbf16>
    %140 = vector.shape_cast %139 : vector<1x128x128xbf16> to vector<128x128xbf16>
    %cst_102 = arith.constant dense<0.000000e+00> : vector<8x128xf32>
    %141 = tpu.matmul %138, %140, %cst_102 {dimension_numbers = #tpu.dot_dimension_numbers<[1], [0], [0], [1], [0, 0, 1, 1], [], []>} : vector<8x128xbf16>, vector<128x128xbf16>, vector<8x128xf32> -> vector<8x128xf32>
    %c3_103 = arith.constant 3 : index
    %c0_104 = arith.constant 0 : index
    %c0_105 = arith.constant 0 : index
    %142 = vector.load %arg5[%c3_103, %c0_104, %c0_105] : memref<4x1x128xf32, #tpu.memory_space<vmem>>, vector<1x1x128xf32>
    %143 = vector.shape_cast %142 : vector<1x1x128xf32> to vector<1x128xf32>
    %144 = vector.broadcast %143 : vector<1x128xf32> to vector<8x128xf32>
    %145 = arith.addf %141, %144 : vector<8x128xf32>
    %cst_106 = arith.constant 0.000000e+00 : f32
    %146 = vector.broadcast %cst_106 : f32 to vector<8x128xf32>
    %147 = arith.maximumf %145, %146 : vector<8x128xf32>
    %148 = arith.truncf %147 : vector<8x128xf32> to vector<8x128xbf16>
    %c3_107 = arith.constant 3 : index
    %c0_108 = arith.constant 0 : index
    %c0_109 = arith.constant 0 : index
    %149 = vector.load %arg6[%c3_107, %c0_108, %c0_109] : memref<4x128x128xbf16, #tpu.memory_space<vmem>>, vector<1x128x128xbf16>
    %150 = vector.shape_cast %149 : vector<1x128x128xbf16> to vector<128x128xbf16>
    %cst_110 = arith.constant dense<0.000000e+00> : vector<8x128xf32>
    %151 = tpu.matmul %148, %150, %cst_110 {dimension_numbers = #tpu.dot_dimension_numbers<[1], [0], [0], [1], [0, 0, 1, 1], [], []>} : vector<8x128xbf16>, vector<128x128xbf16>, vector<8x128xf32> -> vector<8x128xf32>
    %c3_111 = arith.constant 3 : index
    %c0_112 = arith.constant 0 : index
    %c0_113 = arith.constant 0 : index
    %152 = vector.load %arg7[%c3_111, %c0_112, %c0_113] : memref<4x1x128xf32, #tpu.memory_space<vmem>>, vector<1x1x128xf32>
    %153 = vector.shape_cast %152 : vector<1x1x128xf32> to vector<1x128xf32>
    %154 = vector.broadcast %153 : vector<1x128xf32> to vector<8x128xf32>
    %155 = arith.addf %151, %154 : vector<8x128xf32>
    %cst_114 = arith.constant 0.000000e+00 : f32
    %156 = vector.broadcast %cst_114 : f32 to vector<8x128xf32>
    %157 = arith.maximumf %155, %156 : vector<8x128xf32>
    %158 = arith.truncf %157 : vector<8x128xf32> to vector<8x128xbf16>
    %c3_115 = arith.constant 3 : index
    %c0_116 = arith.constant 0 : index
    %c128 = arith.constant 128 : index
    %159 = vector.load %arg8[%c3_115, %c0_116, %c128] : memref<4x128x256xbf16, #tpu.memory_space<vmem>>, vector<1x128x128xbf16>
    %160 = vector.shape_cast %159 : vector<1x128x128xbf16> to vector<128x128xbf16>
    %cst_117 = arith.constant dense<0.000000e+00> : vector<8x128xf32>
    %161 = tpu.matmul %158, %160, %cst_117 {dimension_numbers = #tpu.dot_dimension_numbers<[1], [0], [0], [1], [0, 0, 1, 1], [], []>} : vector<8x128xbf16>, vector<128x128xbf16>, vector<8x128xf32> -> vector<8x128xf32>
    %c3_118 = arith.constant 3 : index
    %c0_119 = arith.constant 0 : index
    %c128_120 = arith.constant 128 : index
    %162 = vector.load %arg9[%c3_118, %c0_119, %c128_120] : memref<4x1x256xf32, #tpu.memory_space<vmem>>, vector<1x1x128xf32>
    %163 = vector.shape_cast %162 : vector<1x1x128xf32> to vector<1x128xf32>
    %164 = vector.broadcast %163 : vector<1x128xf32> to vector<8x128xf32>
    %165 = arith.addf %161, %164 : vector<8x128xf32>
    %166 = arith.addf %127, %165 : vector<8x128xf32>
    %c0_121 = arith.constant 0 : index
    %c0_122 = arith.constant 0 : index
    %167 = vector.load %arg10[%c0_121, %c0_122] : memref<8x128xf32, #tpu.memory_space<vmem>>, vector<8x128xf32>
    tpu.vector_store %arg10[%c0_121, %c0_122], %166 {strides = array<i32>} : memref<8x128xf32, #tpu.memory_space<vmem>>, vector<8x128xf32>,
    return
  }
  func.func @transform_0(%arg0: i32) -> (i32, i32) {
    %c0_i32 = arith.constant 0 : i32
    %c0_i32_0 = arith.constant 0 : i32
    return %arg0, %c0_i32 : i32, i32
  }
  func.func @transform_1(%arg0: i32) -> (i32, i32, i32) {
    %c0_i32 = arith.constant 0 : i32
    %c0_i32_0 = arith.constant 0 : i32
    %c0_i32_1 = arith.constant 0 : i32
    %c0_i32_2 = arith.constant 0 : i32
    return %c0_i32, %c0_i32_0, %c0_i32_1 : i32, i32, i32
  }
  func.func @transform_2(%arg0: i32) -> (i32, i32, i32) {
    %c0_i32 = arith.constant 0 : i32
    %c0_i32_0 = arith.constant 0 : i32
    %c0_i32_1 = arith.constant 0 : i32
    %c0_i32_2 = arith.constant 0 : i32
    return %c0_i32, %c0_i32_0, %c0_i32_1 : i32, i32, i32
  }
  func.func @transform_3(%arg0: i32) -> (i32, i32, i32) {
    %c0_i32 = arith.constant 0 : i32
    %c0_i32_0 = arith.constant 0 : i32
    %c0_i32_1 = arith.constant 0 : i32
    %c0_i32_2 = arith.constant 0 : i32
    return %c0_i32, %c0_i32_0, %c0_i32_1 : i32, i32, i32
  }
  func.func @transform_4(%arg0: i32) -> (i32, i32, i32) {
    %c0_i32 = arith.constant 0 : i32
    %c0_i32_0 = arith.constant 0 : i32
    %c0_i32_1 = arith.constant 0 : i32
    %c0_i32_2 = arith.constant 0 : i32
    return %c0_i32, %c0_i32_0, %c0_i32_1 : i32, i32, i32
  }
  func.func @transform_5(%arg0: i32) -> (i32, i32, i32) {
    %c0_i32 = arith.constant 0 : i32
    %c0_i32_0 = arith.constant 0 : i32
    %c0_i32_1 = arith.constant 0 : i32
    %c0_i32_2 = arith.constant 0 : i32
    return %c0_i32, %c0_i32_0, %c0_i32_1 : i32, i32, i32
  }
  func.func @transform_6(%arg0: i32) -> (i32, i32, i32) {
    %c0_i32 = arith.constant 0 : i32
    %c0_i32_0 = arith.constant 0 : i32
    %c0_i32_1 = arith.constant 0 : i32
    %c0_i32_2 = arith.constant 0 : i32
    return %c0_i32, %c0_i32_0, %c0_i32_1 : i32, i32, i32
  }
  func.func @transform_7(%arg0: i32) -> (i32, i32, i32) {
    %c0_i32 = arith.constant 0 : i32
    %c0_i32_0 = arith.constant 0 : i32
    %c0_i32_1 = arith.constant 0 : i32
    %c0_i32_2 = arith.constant 0 : i32
    return %c0_i32, %c0_i32_0, %c0_i32_1 : i32, i32, i32
  }
  func.func @transform_8(%arg0: i32) -> (i32, i32, i32) {
    %c0_i32 = arith.constant 0 : i32
    %c0_i32_0 = arith.constant 0 : i32
    %c0_i32_1 = arith.constant 0 : i32
    %c0_i32_2 = arith.constant 0 : i32
    return %c0_i32, %c0_i32_0, %c0_i32_1 : i32, i32, i32
  }
  func.func @transform_9(%arg0: i32) -> (i32, i32) {
    %c0_i32 = arith.constant 0 : i32
    %c0_i32_0 = arith.constant 0 : i32
    return %arg0, %c0_i32 : i32, i32
  }
}

</mosaic_0001>

<bundles_post_ra>
// kernel: tpu_custom_call.1
= control target key start
LH: loop header
LB: loop body
LE: loop exit
PB: predicated region body
PF: predicated region fallthrough
CT: control target
= control target key end

     0   :  { %14 = vsyncpa [#allocation3], 0  ;;  %s2830_s0 = inlined_call_operand.hbm [shape: f32[8,128], index: 0, kind: input, shape index: {}]   ;;  %s2831_s1 = inlined_call_operand.hbm [shape: bf16[4,128,128], index: 1, kind: input, shape index: {}]   ;;  %s2832_s2 = inlined_call_operand.hbm [shape: f32[4,1,128], index: 2, kind: input, shape index: {}]   ;;  %s2833_s3 = inlined_call_operand.hbm [shape: bf16[4,128,128], index: 3, kind: input, shape index: {}]   ;;  %s2834_s4 = inlined_call_operand.hbm [shape: f32[4,1,128], index: 4, kind: input, shape index: {}]   ;;  %s2835_s5 = inlined_call_operand.hbm [shape: bf16[4,128,128], index: 5, kind: input, shape index: {}]   ;;  %s2836_s6 = inlined_call_operand.vmem [shape: f32[4,1,128], index: 6, kind: input, shape index: {}]   ;;  %s2837_s7 = inlined_call_operand.hbm [shape: bf16[4,128,256], index: 7, kind: input, shape index: {}]   ;;  %s2838_s8 = inlined_call_operand.hbm [shape: f32[4,1,256], index: 8, kind: input, shape index: {}]   ;;  %s2839_s9 = inlined_call_operand.hbm [shape: f32[8,128], index: 9, kind: output, shape index: {}]  }
   0x1   :  { %15 = vsyncpa [#allocation6], 0 }
   0x2   :  { %16 = vsyncpa [#allocation9], 0 }
   0x3   :  { %17 = vsyncpa [#allocation12], 0 }
   0x4   :  { %18 = vsyncpa [#allocation15], 0  ;;  %s35_s11 = sshll.u32 %s2831_s1, 4  ;;  %s36_s11 = int_to_ptr.hbm [resolvable:$true] %s35_s11 }
   0x5   :  { %19 = vsyncpa [#allocation4], 0  ;;  %s2696_s12 = smov [#allocation5]   ;;  %s61_s16 = sshll.u32 %s2833_s3, 4  ;;  %s62_s16 = int_to_ptr.hbm [resolvable:$true] %s61_s16 }
   0x6   :  { %s37_s13 = sshll.u32 %s2696_s12, 4  ;;  %s2697_s17 = smov 64   ;;  %s38_s13 = int_to_ptr.vmem [resolvable:$true] %s37_s13 }
   0x7   :  { %s2698_s18 = smov 4   ;;  %s2699_s19 = smov [#allocation8]  }
   0x8   :  { %43 = dma.hbm_to_vmem [thread:$0]  %s36_s11, 4096, %s38_s13, [#allocation6], %s2697_s17, %s2697_s17, %s2698_s18  }
   0x9   :  { %s63_s20 = sshll.u32 %s2699_s19, 4  ;;  %s87_s23 = sshll.u32 %s2835_s5, 4  ;;  %s64_s20 = int_to_ptr.vmem [resolvable:$true] %s63_s20  ;;  %s88_s23 = int_to_ptr.hbm [resolvable:$true] %s87_s23 }
   0xa   :  { %69 = dma.hbm_to_vmem [thread:$0]  %s62_s16, 4096, %s64_s20, [#allocation9], %s2697_s17, %s2697_s17, %s2698_s18  }
   0xb   :  { %s25_s25 = sshll.u32 %s2830_s0, 4  ;;  %s2700_s26 = smov [#allocation11]   ;;  %s26_s25 = int_to_ptr.hbm [resolvable:$true] %s25_s25 }
   0xc   :  { %s89_s27 = sshll.u32 %s2700_s26, 4  ;;  %s2701_s3 = smov [#allocation2]   ;;  %s90_s27 = int_to_ptr.vmem [resolvable:$true] %s89_s27 }
   0xd   :  { %95 = dma.hbm_to_vmem [thread:$0]  %s88_s23, 4096, %s90_s27, [#allocation12], %s2697_s17, %s2697_s17, %s2698_s18  }
   0xe   :  { %s27_s28 = sshll.u32 %s2701_s3, 4  ;;  %s48_s10 = sshll.u32 %s2832_s2, 4  ;;  %s28_s28 = int_to_ptr.vmem [resolvable:$true] %s27_s28  ;;  %s49_s10 = int_to_ptr.hbm [resolvable:$true] %s48_s10 }
   0xf   :  { %30 = dma.hbm_to_vmem [thread:$0]  %s26_s25, 128, %s28_s28, [#allocation3]  }
  0x10   :  { %s2702_s5 = smov [#allocation7]   ;;  %s74_s0 = sshll.u32 %s2834_s4, 4  ;;  %s75_s0 = int_to_ptr.hbm [resolvable:$true] %s74_s0 }
  0x11   :  { %s50_s11 = sshll.u32 %s2702_s5, 4  ;;  %s2703_s14 = smov 16   ;;  %s51_s11 = int_to_ptr.vmem [resolvable:$true] %s50_s11 }
  0x12   :  { %s2704_s15 = smov 1   ;;  %s2705_s16 = smov [#allocation10]  }
  0x13   :  { %56 = dma.hbm_to_vmem [thread:$0]  %s49_s10, 64, %s51_s11, [#allocation6], %s2703_s14, %s2703_s14, %s2704_s15  }
  0x14   :  { %s76_s17 = sshll.u32 %s2705_s16, 4  ;;  %s102_s2 = sshll.u32 %s2837_s7, 4  ;;  %s77_s17 = int_to_ptr.vmem [resolvable:$true] %s76_s17  ;;  %s103_s2 = int_to_ptr.hbm [resolvable:$true] %s102_s2 }
  0x15   :  { %82 = dma.hbm_to_vmem [thread:$0]  %s75_s0, 64, %s77_s17, [#allocation9], %s2703_s14, %s2703_s14, %s2704_s15  }
  0x16   :  { %s2706_s20 = smov [#allocation13]   ;;  %s115_s4 = sshll.u32 %s2838_s8, 4  ;;  %s116_s4 = int_to_ptr.hbm [resolvable:$true] %s115_s4 }
  0x17   :  { %s104_s21 = sshll.u32 %s2706_s20, 4  ;;  %s2707_s1 = smov 128   ;;  %s105_s21 = int_to_ptr.vmem [resolvable:$true] %s104_s21 }
  0x18   :  { %s2708_s24 = smov 8   ;;  %s2709_s25 = smov [#allocation14]  }
  0x19   :  { %110 = dma.hbm_to_vmem [thread:$0]  %s103_s2, 8192, %s105_s21, [#allocation12], %s2707_s1, %s2707_s1, %s2708_s24  }
  0x1a   :  { %s117_s26 = sshll.u32 %s2709_s25, 4  ;;  %s2710_s27 = smov 32   ;;  %s118_s26 = int_to_ptr.vmem [resolvable:$true] %s117_s26 }
  0x1b   :  { %s2711_s3 = smov 2  }
  0x1c   :  { %123 = dma.hbm_to_vmem [thread:$0]  %s116_s4, 128, %s118_s26, [#allocation15], %s2710_s27, %s2710_s27, %s2711_s3  }
  0x1d   :  { %2684 = dma.done.wait [#allocation3], 128  }
  0x1e   :  { %2685 = vsyncadd [#allocation3], 4294967168 }
  0x1f   :  { %2686 = dma.done.wait [#allocation6], 4160  }
  0x20   :  { %2687 = vsyncadd [#allocation6], 4294963136 }
  0x21   :  { %2688 = dma.done.wait [#allocation9], 4160  }
  0x22   :  { %2689 = vsyncadd [#allocation9], 4294963136 }
  0x23   :  { %2690 = dma.done.wait [#allocation12], 12288  }
  0x24   :  { %2691 = vsyncadd [#allocation12], 4294955008 }
  0x25   :  { %2692 = dma.done.wait [#allocation15], 128  }
  0x26   :  { %2693 = vsyncadd [#allocation15], 4294967168  ;;  %v2293_v0 = vld [vmem:[#allocation5 + $0x38] sm:$0xff]  ;;  %v2292_v1 = vld [vmem:[#allocation5 + $0x30] sm:$0xff]  ;;  %s2712_s12 = smov [#allocation16]   ;;  %s1661_s15 = sshll.u32 %s2839_s9, 4  ;;  %s1662_s15 = int_to_ptr.hbm [resolvable:$true] %s1661_s15 }
  0x27   :  { %226 = vmatpush.bf16.msra.mxu0 %v2293_v0  ;;  %v2301_v2 = vld [vmem:[#allocation8 + $0x38] sm:$0xff]  ;;  %v2291_v3 = vld [vmem:[#allocation5 + $0x28] sm:$0xff]  ;;  %v2300_v4 = vld [vmem:[#allocation8 + $0x30] sm:$0xff]  ;;  %s1659_s13 = sshll.u32 %s2712_s12, 4  ;;  %s1660_s13 = int_to_ptr.vmem [resolvable:$true] %s1659_s13 }
  0x28   :  { %309 = vmatpush.bf16.msra.mxu1 %v2301_v2  ;;  %v2299_v5 = vld [vmem:[#allocation8 + $0x28] sm:$0xff]  ;;  %v2290_v6 = vld [vmem:[#allocation5 + $0x20] sm:$0xff]  ;;  %v2289_v8 = vld [vmem:[#allocation5 + $0x18] sm:$0xff] }
  0x29   :  { %v2298_v7 = vld [vmem:[#allocation8 + $0x20] sm:$0xff]  ;;  %v2297_v9 = vld [vmem:[#allocation8 + $0x18] sm:$0xff]  ;;  %v2288_v10 = vld [vmem:[#allocation5 + $0x10] sm:$0xff] }
  0x2a   :  { %v2296_v11 = vld [vmem:[#allocation8 + $0x10] sm:$0xff]  ;;  %v2287_v12 = vld [vmem:[#allocation5 + $0x8] sm:$0xff]  ;;  %v2286_v13 = vld [vmem:[#allocation5] sm:$0xff] }
  0x2b   :  { %227 = vmatpush.bf16.msra.mxu0 %v2292_v1  ;;  %v2787_v14 = vld [vmem:[#allocation2] sm:$0xff]  ;;  %v2295_v16 = vld [vmem:[#allocation8 + $0x8] sm:$0xff]  ;;  %v2294_v17 = vld [vmem:[#allocation8] sm:$0xff] }
  0x2c   :  { %310 = vmatpush.bf16.msra.mxu1 %v2300_v4  ;;  %v157_v15 = vpack.c.bf16 %v2787_v14, %v2787_v14  ;;  %v2309_v18 = vld [vmem:[#allocation11 + $0x38] sm:$0xff]  ;;  %v2308_v19 = vld [vmem:[#allocation11 + $0x30] sm:$0xff]  ;;  %v2307_v20 = vld [vmem:[#allocation11 + $0x28] sm:$0xff] }
  0x2d   :  { %392 = vmatpush.bf16.msra.mxu2 %v2309_v18  ;;  %v2306_v21 = vld [vmem:[#allocation11 + $0x20] sm:$0xff]  ;;  %v2305_v22 = vld [vmem:[#allocation11 + $0x18] sm:$0xff]  ;;  %v2304_v23 = vld [vmem:[#allocation11 + $0x10] sm:$0xff] }
  0x2e   :  { %v2455_v24 = vld [vmem:[#allocation7] ss:$0 sm:$0xff]  ;;  %v2303_v30 = vld [vmem:[#allocation11 + $0x8] sm:$0xff]  ;;  %v2302_v31 = vld [vmem:[#allocation11] sm:$0xff] }
  0x2f   :  { %228 = vmatpush.bf16.msra.mxu0 %v2291_v3  ;;  %v1829_v32 = vld [vmem:[#allocation13 + $0x70] sm:$0xf]  ;;  %v2325_v33 = vld [vmem:[#allocation13 + $0x74] sm:$0xf0]  ;;  %v2324_v34 = vld [vmem:[#allocation13 + $0x74] sm:$0xf] }
  0x30   :  { %311 = vmatpush.bf16.msra.mxu1 %v2299_v5  ;;  %v1830_v35 = vor.u32 %v2325_v33, %v1829_v32  ;;  %v1831_v36 = vld [vmem:[#allocation13 + $0x78] sm:$0xf0]  ;;  %v1821_v37 = vld [vmem:[#allocation13 + $0x60] sm:$0xf]  ;;  %v2323_v38 = vld [vmem:[#allocation13 + $0x64] sm:$0xf0] }
  0x31   :  { %393 = vmatpush.bf16.msra.mxu2 %v2308_v19  ;;  %v1834_v39 = vor.u32 %v2324_v34, %v1831_v36  ;;  %v2322_v40 = vld [vmem:[#allocation13 + $0x64] sm:$0xf]  ;;  %v1823_v41 = vld [vmem:[#allocation13 + $0x68] sm:$0xf0]  ;;  %v1822_v42 = vor.u32 %v2323_v38, %v1821_v37  ;;  %v1813_v44 = vld [vmem:[#allocation13 + $0x50] sm:$0xf] }
  0x32   :  { %509 = vmatpush.bf16.msra.mxu3 %v1830_v35  ;;  %v1826_v43 = vor.u32 %v2322_v40, %v1823_v41  ;;  %v2321_v45 = vld [vmem:[#allocation13 + $0x54] sm:$0xf0]  ;;  %v2320_v46 = vld [vmem:[#allocation13 + $0x54] sm:$0xf]  ;;  %v1815_v47 = vld [vmem:[#allocation13 + $0x58] sm:$0xf0] }
  0x33   :  { %229 = vmatpush.bf16.msra.mxu0 %v2290_v6  ;;  %v1814_v48 = vor.u32 %v2321_v45, %v1813_v44  ;;  %v1818_v49 = vor.u32 %v2320_v46, %v1815_v47  ;;  %v1805_v50 = vld [vmem:[#allocation13 + $0x40] sm:$0xf]  ;;  %v2319_v51 = vld [vmem:[#allocation13 + $0x44] sm:$0xf0]  ;;  %v2318_v52 = vld [vmem:[#allocation13 + $0x44] sm:$0xf] }
  0x34   :  { %312 = vmatpush.bf16.msra.mxu1 %v2298_v7  ;;  %v1807_v53 = vld [vmem:[#allocation13 + $0x48] sm:$0xf0]  ;;  %v1806_v54 = vor.u32 %v2319_v51, %v1805_v50  ;;  %v1797_v56 = vld [vmem:[#allocation13 + $0x30] sm:$0xf]  ;;  %v2317_v57 = vld [vmem:[#allocation13 + $0x34] sm:$0xf0] }
  0x35   :  { %394 = vmatpush.bf16.msra.mxu2 %v2307_v20  ;;  %v1810_v55 = vor.u32 %v2318_v52, %v1807_v53  ;;  %v2316_v58 = vld [vmem:[#allocation13 + $0x34] sm:$0xf]  ;;  %v1799_v59 = vld [vmem:[#allocation13 + $0x38] sm:$0xf0]  ;;  %v1798_v60 = vor.u32 %v2317_v57, %v1797_v56  ;;  %v1789_v62 = vld [vmem:[#allocation13 + $0x20] sm:$0xf] }
  0x36   :  { %510 = vmatpush.bf16.msra.mxu3 %v1822_v42  ;;  %v1802_v61 = vor.u32 %v2316_v58, %v1799_v59  ;;  %v2315_v63 = vld [vmem:[#allocation13 + $0x24] sm:$0xf0]  ;;  %v2314_v0 = vld [vmem:[#allocation13 + $0x24] sm:$0xf]  ;;  %v1791_v1 = vld [vmem:[#allocation13 + $0x28] sm:$0xf0] }
  0x37   :  { %230 = vmatpush.bf16.msra.mxu0 %v2289_v8  ;;  %v1790_v2 = vor.u32 %v2315_v63, %v1789_v62  ;;  %v1794_v3 = vor.u32 %v2314_v0, %v1791_v1  ;;  %v2456_v4 = vld [vmem:[#allocation10] ss:$0 sm:$0xff]  ;;  %v2311_v18 = vld [vmem:[#allocation13 + $0x4] sm:$0xf0]  ;;  %v2310_v19 = vld [vmem:[#allocation13 + $0x4] sm:$0xf] }
  0x38   :  { %313 = vmatpush.bf16.msra.mxu1 %v2297_v9  ;;  %v2328_v34 = vld [vmem:[#allocation5 + $0x50] sm:$0xff]  ;;  %v2327_v35 = vld [vmem:[#allocation5 + $0x48] sm:$0xff]  ;;  %v2326_v36 = vld [vmem:[#allocation5 + $0x40] sm:$0xff] }
  0x39   :  { %395 = vmatpush.bf16.msra.mxu2 %v2306_v21  ;;  %v1775_v21 = vld [vmem:[#allocation13 + $0x8] sm:$0xf0]  ;;  %v2341_v37 = vld [vmem:[#allocation8 + $0x78] sm:$0xff]  ;;  %v2338_v40 = vld [vmem:[#allocation8 + $0x60] sm:$0xff] }
  0x3a   :  { %511 = vmatpush.bf16.msra.mxu3 %v1814_v48  ;;  %v2340_v38 = vld [vmem:[#allocation8 + $0x70] sm:$0xff]  ;;  %v2337_v41 = vld [vmem:[#allocation8 + $0x58] sm:$0xff]  ;;  %v2796_v44 = vld [vmem:[#allocation14] sm:$0x3] }
  0x3b   :  { %231 = vmatpush.bf16.msra.mxu0 %v2288_v10  ;;  %v1781_v10 = vld [vmem:[#allocation13 + $0x10] sm:$0xf]  ;;  %v425_v45 = vperm.slane %v2796_v44, 0  ;;  %v2335_v52 = vld [vmem:[#allocation8 + $0x48] sm:$0xff]  ;;  %v2334_v53 = vld [vmem:[#allocation8 + $0x40] sm:$0xff] }
  0x3c   :  { %314 = vmatpush.bf16.msra.mxu1 %v2296_v11  ;;  %v2313_v11 = vld [vmem:[#allocation13 + $0x14] sm:$0xf0]  ;;  %v2347_v56 = vld [vmem:[#allocation11 + $0x68] sm:$0xff]  ;;  %v2346_v57 = vld [vmem:[#allocation11 + $0x60] sm:$0xff] }
  0x3d   :  { %396 = vmatpush.bf16.msra.mxu2 %v2305_v22  ;;  %v1778_v22 = vor.u32 %v2310_v19, %v1775_v21  ;;  %v2345_v58 = vld [vmem:[#allocation11 + $0x58] sm:$0xff]  ;;  %v2343_v1 = vld [vmem:[#allocation11 + $0x48] sm:$0xff] }
  0x3e   :  { %512 = vmatpush.bf16.msra.mxu3 %v1806_v54  ;;  %v2349_v54 = vld [vmem:[#allocation11 + $0x78] sm:$0xff] }
  0x3f   :  { %232 = vmatpush.bf16.msra.mxu0 %v2287_v12  ;;  %v2312_v12 = vld [vmem:[#allocation13 + $0x14] sm:$0xf]  ;;  %v2458_v59 = vld [vmem:[#allocation7 + $0x1] ss:$0 sm:$0xff]  ;;  %v1976_v19 = vld [vmem:[#allocation13 + $0xd8] sm:$0xf0] }
  0x40   :  { %315 = vmatpush.bf16.msra.mxu1 %v2295_v16 }
  0x41   :  { %397 = vmatpush.bf16.msra.mxu2 %v2304_v23  ;;  %v2333_v23 = vld [vmem:[#allocation5 + $0x78] sm:$0xff] }
  0x42   :  { %513 = vmatpush.bf16.msra.mxu3 %v1798_v60 }
  0x43   :  { %233 = vmatpush.bf16.msra.mxu0 %v2286_v13  ;;  %v1782_v13 = vor.u32 %v2313_v11, %v1781_v10  ;;  %v2362_v11 = vld [vmem:[#allocation13 + $0xe4] sm:$0xf] }
  0x44   :  { %316 = vmatpush.bf16.msra.mxu1 %v2294_v17  ;;  %v1773_v17 = vld [vmem:[#allocation13] sm:$0xf] }
  0x45   :  { %398 = vmatpush.bf16.msra.mxu2 %v2303_v30  ;;  %v1774_v20 = vor.u32 %v2311_v18, %v1773_v17  ;;  %v2361_v17 = vld [vmem:[#allocation13 + $0xd4] sm:$0xf0]  ;;  %v2360_v18 = vld [vmem:[#allocation13 + $0xd4] sm:$0xf] }
  0x46   :  { %234 = vmatmul.bf16.vlgmr.msra.gmra.mxu0 %v157_v15  ;;  %514 = vmatpush.bf16.msra.mxu3 %v1790_v2  ;;  %v1783_v15 = vld [vmem:[#allocation13 + $0x18] sm:$0xf0]  ;;  %v2342_v2 = vld [vmem:[#allocation11 + $0x40] sm:$0xff]  ;;  %v1979_v21 = vor.u32 %v2360_v18, %v1976_v19  ;;  %v426_v18 = vperm.slane %v2796_v44, 1 }
  0x47   :  { %522 = vmatpush.bf16.msrb.mxu0 %v1834_v39  ;;  %v1786_v16 = vor.u32 %v2312_v12, %v1783_v15  ;;  %v2339_v39 = vld [vmem:[#allocation8 + $0x68] sm:$0xff]  ;;  %v1984_v12 = vld [vmem:[#allocation13 + $0xe8] sm:$0xf0] }
  0x48   :  { %608 = vmatpush.bf16.msrb.mxu1 %v2333_v23  ;;  %v1987_v15 = vor.u32 %v2362_v11, %v1984_v12  ;;  %v2359_v23 = vld [vmem:[#allocation13 + $0xc4] sm:$0xf0]  ;;  %v2380_v11 = vld [vmem:[#allocation8 + $0xb0] sm:$0xff] }
  0x49   :  { %399 = vmatpush.bf16.msra.mxu2 %v2302_v31  ;;  %v2379_v12 = vld [vmem:[#allocation8 + $0xa8] sm:$0xff] }
  0x4a   :  { %515 = vmatpush.bf16.msra.mxu3 %v1782_v13 }
  0x4b   :  { %523 = vmatpush.bf16.msrb.mxu0 %v1826_v43  ;;  %v2336_v43 = vld [vmem:[#allocation8 + $0x50] sm:$0xff] }
  0x4d   :  { %693 = vmatpush.bf16.msrb.mxu2 %v2341_v37  ;;  %v1952_v37 = vld [vmem:[#allocation13 + $0xa8] sm:$0xf0] }
  0x4e   :  { %516 = vmatpush.bf16.msra.mxu3 %v1774_v20 }
  0x4f   :  { %524 = vmatpush.bf16.msrb.mxu0 %v1818_v49 }
  0x51   :  { %694 = vmatpush.bf16.msrb.mxu2 %v2340_v38 }
  0x52   :  { %778 = vmatpush.bf16.msrb.mxu3 %v2349_v54 }
  0x53   :  { %525 = vmatpush.bf16.msrb.mxu0 %v1810_v55  ;;  %v2348_v55 = vld [vmem:[#allocation11 + $0x70] sm:$0xff] }
  0x55   :  { %695 = vmatpush.bf16.msrb.mxu2 %v2339_v39 }
  0x56   :  { %779 = vmatpush.bf16.msrb.mxu3 %v2348_v55  ;;  %v1934_v55 = vld [vmem:[#allocation13 + $0x80] sm:$0xf] }
  0x57   :  { %526 = vmatpush.bf16.msrb.mxu0 %v1802_v61 }
  0x59   :  { %696 = vmatpush.bf16.msrb.mxu2 %v2338_v40  ;;  %v2459_v40 = vld [vmem:[#allocation10 + $0x1] ss:$0 sm:$0xff] }
  0x5a   :  { %780 = vmatpush.bf16.msrb.mxu3 %v2347_v56  ;;  %v2351_v56 = vld [vmem:[#allocation13 + $0x84] sm:$0xf0] }
  0x5b   :  { %527 = vmatpush.bf16.msrb.mxu0 %v1794_v3  ;;  %v1990_v3 = vld [vmem:[#allocation13 + $0xf0] sm:$0xf] }
  0x5d   :  { %697 = vmatpush.bf16.msrb.mxu2 %v2337_v41 }
  0x5e   :  { %781 = vmatpush.bf16.msrb.mxu3 %v2346_v57  ;;  %v2350_v57 = vld [vmem:[#allocation13 + $0x84] sm:$0xf] }
  0x5f   :  { %528 = vmatpush.bf16.msrb.mxu0 %v1786_v16  ;;  %v1974_v16 = vld [vmem:[#allocation13 + $0xd0] sm:$0xf] }
  0x60   :  { %v1975_v20 = vor.u32 %v2361_v17, %v1974_v16  ;;  %v811_v16 = vld [vmem:[#allocation14 + $0x2] sm:$0x3]  ;;  %v2376_v17 = vld [vmem:[#allocation8 + $0x90] sm:$0xff] }
  0x61   :  { %698 = vmatpush.bf16.msrb.mxu2 %v2336_v43  ;;  %v813_v19 = vperm.slane %v811_v16, 0 }
  0x62   :  { %782 = vmatpush.bf16.msrb.mxu3 %v2345_v58  ;;  %v1935_v58 = vor.u32 %v2351_v56, %v1934_v55  ;;  %v2402_v55 = vld [vmem:[#allocation13 + $0x164] sm:$0xf]  ;;  %v2145_v56 = vld [vmem:[#allocation13 + $0x168] sm:$0xf0] }
  0x63   :  { %529 = vmatpush.bf16.msrb.mxu0 %v1778_v22  ;;  %v1966_v22 = vld [vmem:[#allocation13 + $0xc0] sm:$0xf] }
  0x65   :  { %699 = vmatpush.bf16.msrb.mxu2 %v2335_v52 }
  0x69   :  { %700 = vmatpush.bf16.msrb.mxu2 %v2334_v53  ;;  %v1944_v53 = vld [vmem:[#allocation13 + $0x98] sm:$0xf0] }
  0xc3   :  { %v235_v25 = vpop.f32.mrf.mxu0 }
  0xc4   :  { %v236_v26 = vadd.f32 %v2455_v24, %v235_v25  ;;  %v2332_v24 = vld [vmem:[#allocation5 + $0x70] sm:$0xff]  ;;  %v2331_v25 = vld [vmem:[#allocation5 + $0x68] sm:$0xff] }
  0xc5   :  { %609 = vmatpush.bf16.msrb.mxu1 %v2332_v24  ;;  %v2358_v24 = vld [vmem:[#allocation13 + $0xc4] sm:$0xf] }
  0xc6   :  { %v239_v27 = vmax.f32 %v236_v26, 0.0  ;;  %v2330_v26 = vld [vmem:[#allocation5 + $0x60] sm:$0xff] }
  0xc8   :  { %v240_v28 = vpack.c.bf16 %v239_v27, %v239_v27  ;;  %v2329_v27 = vld [vmem:[#allocation5 + $0x58] sm:$0xff] }
  0xc9   :  { %610 = vmatpush.bf16.msrb.mxu1 %v2331_v25  ;;  %v1968_v25 = vld [vmem:[#allocation13 + $0xc8] sm:$0xf0] }
  0xca   :  { %317 = vmatmul.bf16.vlgmr.msra.gmra.mxu1 %v240_v28  ;;  %v2457_v28 = vld [vmem:[%s2836_s6] ss:$0 sm:$0xff] }
  0xcb   :  { %v237_v29 = vpop.f32.mrf.mxu0 }
  0xcd   :  { %611 = vmatpush.bf16.msrb.mxu1 %v2330_v26  ;;  %v1967_v26 = vor.u32 %v2359_v23, %v1966_v22 }
  0xd1   :  { %612 = vmatpush.bf16.msrb.mxu1 %v2329_v27  ;;  %v1971_v27 = vor.u32 %v2358_v24, %v1968_v25 }
  0xd5   :  { %613 = vmatpush.bf16.msrb.mxu1 %v2328_v34  ;;  %v1950_v34 = vld [vmem:[#allocation13 + $0xa0] sm:$0xf] }
  0xd9   :  { %614 = vmatpush.bf16.msrb.mxu1 %v2327_v35  ;;  %v2355_v35 = vld [vmem:[#allocation13 + $0xa4] sm:$0xf0] }
  0xda   :  { %v1951_v38 = vor.u32 %v2355_v35, %v1950_v34  ;;  %v2385_v34 = vld [vmem:[#allocation11 + $0x98] sm:$0xff]  ;;  %v2384_v35 = vld [vmem:[#allocation11 + $0x90] sm:$0xff] }
  0xdd   :  { %615 = vmatpush.bf16.msrb.mxu1 %v2326_v36  ;;  %v2354_v36 = vld [vmem:[#allocation13 + $0xa4] sm:$0xf] }
  0xde   :  { %v1955_v39 = vor.u32 %v2354_v36, %v1952_v37  ;;  %v2461_v36 = vld [vmem:[#allocation7 + $0x2] ss:$0 sm:$0xff] }
 0x147   :  { %v318_v5 = vpop.f32.mrf.mxu1 }
 0x148   :  { %v319_v6 = vadd.f32 %v2456_v4, %v318_v5  ;;  %v2365_v4 = vld [vmem:[#allocation13 + $0xf4] sm:$0xf0]  ;;  %v2364_v5 = vld [vmem:[#allocation13 + $0xf4] sm:$0xf] }
 0x14a   :  { %v322_v7 = vmax.f32 %v319_v6, 0.0  ;;  %v1991_v6 = vor.u32 %v2365_v4, %v1990_v3 }
 0x14c   :  { %v323_v8 = vpack.c.bf16 %v322_v7, %v322_v7  ;;  %v1992_v7 = vld [vmem:[#allocation13 + $0xf8] sm:$0xf0]  ;;  %897 = vmatpush.bf16.msra.mxu0 %v1991_v6 }
 0x14d   :  { %v1995_v10 = vor.u32 %v2364_v5, %v1992_v7 }
 0x14e   :  { %400 = vmatmul.bf16.vlgmr.msra.gmra.mxu2 %v323_v8  ;;  %v1982_v8 = vld [vmem:[#allocation13 + $0xe0] sm:$0xf] }
 0x14f   :  { %v320_v9 = vpop.f32.mrf.mxu1  ;;  %910 = vmatpush.bf16.msra.mxu1 %v1995_v10  ;;  %v2381_v10 = vld [vmem:[#allocation8 + $0xb8] sm:$0xff] }
 0x150   :  { %v2363_v9 = vld [vmem:[#allocation13 + $0xe4] sm:$0xf0] }
 0x151   :  { %v1983_v13 = vor.u32 %v2363_v9, %v1982_v8  ;;  %v2367_v8 = vld [vmem:[#allocation5 + $0x88] sm:$0xff]  ;;  %v2366_v9 = vld [vmem:[#allocation5 + $0x80] sm:$0xff] }
 0x153   :  { %898 = vmatpush.bf16.msra.mxu0 %v1983_v13  ;;  %911 = vmatpush.bf16.msra.mxu1 %v1987_v15  ;;  %v2378_v13 = vld [vmem:[#allocation8 + $0xa0] sm:$0xff]  ;;  %v2377_v15 = vld [vmem:[#allocation8 + $0x98] sm:$0xff] }
 0x157   :  { %899 = vmatpush.bf16.msra.mxu0 %v1975_v20  ;;  %912 = vmatpush.bf16.msra.mxu1 %v1979_v21  ;;  %v814_v20 = vperm.slane %v811_v16, 1  ;;  %v2113_v16 = vld [vmem:[#allocation13 + $0x128] sm:$0xf0] }
 0x15b   :  { %900 = vmatpush.bf16.msra.mxu0 %v1967_v26  ;;  %913 = vmatpush.bf16.msra.mxu1 %v1971_v27 }
 0x1d1   :  { %v401_v29 = vpop.f32.mrf.mxu2 }
 0x1d2   :  { %v402_v30 = vadd.f32 %v2457_v28, %v401_v29  ;;  %v1958_v28 = vld [vmem:[#allocation13 + $0xb0] sm:$0xf]  ;;  %v2357_v29 = vld [vmem:[#allocation13 + $0xb4] sm:$0xf0] }
 0x1d4   :  { %v405_v31 = vmax.f32 %v402_v30, 0.0  ;;  %v2356_v30 = vld [vmem:[#allocation13 + $0xb4] sm:$0xf] }
 0x1d6   :  { %v406_v32 = vpack.c.bf16 %v405_v31, %v405_v31  ;;  %v1960_v31 = vld [vmem:[#allocation13 + $0xb8] sm:$0xf0] }
 0x1d8   :  { %517 = vmatmul.bf16.vlgmr.msra.gmra.mxu3 %v406_v32  ;;  %530 = vmatmul.bf16.vlgmr.msrb.gmra.mxu0 %v406_v32  ;;  %v1959_v32 = vor.u32 %v2357_v29, %v1958_v28 }
 0x1d9   :  { %v403_v33 = vpop.f32.mrf.mxu2 }
 0x1da   :  { %v1963_v33 = vor.u32 %v2356_v30, %v1960_v31  ;;  %901 = vmatpush.bf16.msra.mxu0 %v1959_v32  ;;  %v2375_v30 = vld [vmem:[#allocation8 + $0x88] sm:$0xff]  ;;  %v2374_v31 = vld [vmem:[#allocation8 + $0x80] sm:$0xff] }
 0x1db   :  { %v2389_v32 = vld [vmem:[#allocation11 + $0xb8] sm:$0xff] }
 0x1dc   :  { %914 = vmatpush.bf16.msra.mxu1 %v1963_v33  ;;  %v2387_v33 = vld [vmem:[#allocation11 + $0xa8] sm:$0xff] }
 0x1de   :  { %902 = vmatpush.bf16.msra.mxu0 %v1951_v38 }
 0x1e0   :  { %915 = vmatpush.bf16.msra.mxu1 %v1955_v39 }
 0x255   :  { %v2794_v42 = vpop.f32.mrf.mxu0 }
 0x256   :  { %v532_v23 = vadd.f32 %v2794_v42, %v426_v18  ;;  %v2388_v42 = vld [vmem:[#allocation11 + $0xb0] sm:$0xff] }
 0x25b   :  { %v518_v46 = vpop.f32.mrf.mxu3 }
 0x25c   :  { %v519_v47 = vadd.f32 %v518_v46, %v425_v45 }
 0x25d   :  { %v533_v48 = vpop.f32.mrf.mxu0 }
 0x25e   :  { %v2800_v49 = vsub.f32 %v2787_v14, %v519_v47  ;;  %v2344_v14 = vld [vmem:[#allocation11 + $0x50] sm:$0xff] }
 0x25f   :  { %783 = vmatpush.bf16.msrb.mxu3 %v2344_v14  ;;  %v1942_v48 = vld [vmem:[#allocation13 + $0x90] sm:$0xf]  ;;  %v1936_v14 = vld [vmem:[#allocation13 + $0x88] sm:$0xf0] }
 0x260   :  { %v537_v50 = vpack.c.bf16 %v2800_v49, %v2800_v49 }
 0x262   :  { %616 = vmatmul.bf16.vlgmr.msrb.gmra.mxu1 %v537_v50  ;;  %v2353_v50 = vld [vmem:[#allocation13 + $0x94] sm:$0xf0] }
 0x263   :  { %v520_v51 = vpop.f32.mrf.mxu3  ;;  %784 = vmatpush.bf16.msrb.mxu3 %v2343_v1  ;;  %v1943_v52 = vor.u32 %v2353_v50, %v1942_v48  ;;  %v2368_v1 = vld [vmem:[#allocation5 + $0x90] sm:$0xff]  ;;  %v2404_v48 = vld [vmem:[#allocation13 + $0x174] sm:$0xf] }
 0x264   :  { %v2352_v51 = vld [vmem:[#allocation13 + $0x94] sm:$0xf] }
 0x265   :  { %v1947_v54 = vor.u32 %v2352_v51, %v1944_v53  ;;  %903 = vmatpush.bf16.msra.mxu0 %v1943_v52  ;;  %v2153_v51 = vld [vmem:[#allocation13 + $0x178] sm:$0xf0]  ;;  %v2143_v52 = vld [vmem:[#allocation13 + $0x160] sm:$0xf]  ;;  %v2403_v53 = vld [vmem:[#allocation13 + $0x164] sm:$0xf0] }
 0x267   :  { %785 = vmatpush.bf16.msrb.mxu3 %v2342_v2  ;;  %916 = vmatpush.bf16.msra.mxu1 %v1947_v54  ;;  %v2460_v2 = vld [vmem:[%s2836_s6 + $0x1] ss:$0 sm:$0xff]  ;;  %v2156_v54 = vor.u32 %v2404_v48, %v2153_v51  ;;  %v2407_v51 = vld [vmem:[#allocation5 + $0xc8] sm:$0xff] }
 0x269   :  { %904 = vmatpush.bf16.msra.mxu0 %v1935_v58  ;;  %v2148_v58 = vor.u32 %v2402_v55, %v2145_v56  ;;  %v2419_v55 = vld [vmem:[#allocation8 + $0xe8] sm:$0xff]  ;;  %v2418_v56 = vld [vmem:[#allocation8 + $0xe0] sm:$0xff] }
 0x26b   :  { %1081 = vmatpush.bf16.msra.mxu3 %v2381_v10 }
 0x26d   :  { %1166 = vmatpush.bf16.msrb.mxu0 %v2389_v32  ;;  %v2095_v32 = vld [vmem:[#allocation13 + $0x100] sm:$0xf] }
 0x26f   :  { %1082 = vmatpush.bf16.msra.mxu3 %v2380_v11 }
 0x271   :  { %1167 = vmatpush.bf16.msrb.mxu0 %v2388_v42  ;;  %v2391_v42 = vld [vmem:[#allocation13 + $0x104] sm:$0xf0] }
 0x273   :  { %1083 = vmatpush.bf16.msra.mxu3 %v2379_v12  ;;  %v2111_v12 = vld [vmem:[#allocation13 + $0x120] sm:$0xf] }
 0x275   :  { %1168 = vmatpush.bf16.msrb.mxu0 %v2387_v33  ;;  %v2390_v33 = vld [vmem:[#allocation13 + $0x104] sm:$0xf] }
 0x277   :  { %1084 = vmatpush.bf16.msra.mxu3 %v2378_v13  ;;  %v2395_v13 = vld [vmem:[#allocation13 + $0x124] sm:$0xf0] }
 0x27b   :  { %1085 = vmatpush.bf16.msra.mxu3 %v2377_v15  ;;  %v2394_v15 = vld [vmem:[#allocation13 + $0x124] sm:$0xf] }
 0x27c   :  { %v2116_v18 = vor.u32 %v2394_v15, %v2113_v16 }
 0x27f   :  { %1086 = vmatpush.bf16.msra.mxu3 %v2376_v17  ;;  %v2112_v17 = vor.u32 %v2395_v13, %v2111_v12  ;;  %v2424_v12 = vld [vmem:[#allocation11 + $0xd0] sm:$0xff]  ;;  %v2464_v13 = vld [vmem:[#allocation7 + $0x3] ss:$0 sm:$0xff] }
 0x283   :  { %1087 = vmatpush.bf16.msra.mxu3 %v2375_v30  ;;  %v2105_v30 = vld [vmem:[#allocation13 + $0x118] sm:$0xf0] }
 0x287   :  { %1088 = vmatpush.bf16.msra.mxu3 %v2374_v31 }
 0x2df   :  { %v617_v60 = vpop.f32.mrf.mxu1 }
 0x2e0   :  { %v618_v61 = vadd.f32 %v2458_v59, %v617_v60  ;;  %v1939_v59 = vor.u32 %v2350_v57, %v1936_v14  ;;  %v2373_v60 = vld [vmem:[#allocation5 + $0xb8] sm:$0xff]  ;;  %v2144_v57 = vor.u32 %v2403_v53, %v2143_v52  ;;  %v2406_v52 = vld [vmem:[#allocation5 + $0xc0] sm:$0xff] }
 0x2e1   :  { %996 = vmatpush.bf16.msra.mxu2 %v2373_v60  ;;  %v2135_v14 = vld [vmem:[#allocation13 + $0x150] sm:$0xf]  ;;  %v2400_v60 = vld [vmem:[#allocation13 + $0x154] sm:$0xf] }
 0x2e2   :  { %v621_v62 = vmax.f32 %v618_v61, 0.0  ;;  %917 = vmatpush.bf16.msra.mxu1 %v1939_v59  ;;  %v2372_v61 = vld [vmem:[#allocation5 + $0xb0] sm:$0xff]  ;;  %v2401_v59 = vld [vmem:[#allocation13 + $0x154] sm:$0xf0] }
 0x2e3   :  { %v2421_v53 = vld [vmem:[#allocation8 + $0xf8] sm:$0xff] }
 0x2e4   :  { %v622_v63 = vpack.c.bf16 %v621_v62, %v621_v62  ;;  %v2371_v62 = vld [vmem:[#allocation5 + $0xa8] sm:$0xff] }
 0x2e5   :  { %997 = vmatpush.bf16.msra.mxu2 %v2372_v61  ;;  %v2137_v61 = vld [vmem:[#allocation13 + $0x158] sm:$0xf0] }
 0x2e6   :  { %701 = vmatmul.bf16.vlgmr.msrb.gmra.mxu2 %v622_v63  ;;  %v2370_v63 = vld [vmem:[#allocation5 + $0xa0] sm:$0xff] }
 0x2e7   :  { %v619_v0 = vpop.f32.mrf.mxu1 }
 0x2e8   :  { %v2369_v0 = vld [vmem:[#allocation5 + $0x98] sm:$0xff] }
 0x2e9   :  { %998 = vmatpush.bf16.msra.mxu2 %v2371_v62  ;;  %v2136_v62 = vor.u32 %v2401_v59, %v2135_v14 }
 0x2ed   :  { %999 = vmatpush.bf16.msra.mxu2 %v2370_v63  ;;  %v2140_v63 = vor.u32 %v2400_v60, %v2137_v61  ;;  %v2416_v60 = vld [vmem:[#allocation8 + $0xd0] sm:$0xff] }
 0x2f1   :  { %1000 = vmatpush.bf16.msra.mxu2 %v2369_v0  ;;  %v2127_v0 = vld [vmem:[#allocation13 + $0x140] sm:$0xf] }
 0x2f5   :  { %1001 = vmatpush.bf16.msra.mxu2 %v2368_v1  ;;  %v2399_v1 = vld [vmem:[#allocation13 + $0x144] sm:$0xf0] }
 0x2f9   :  { %1002 = vmatpush.bf16.msra.mxu2 %v2367_v8  ;;  %v2396_v8 = vld [vmem:[#allocation13 + $0x134] sm:$0xf] }
 0x2fd   :  { %1003 = vmatpush.bf16.msra.mxu2 %v2366_v9  ;;  %v2121_v9 = vld [vmem:[#allocation13 + $0x138] sm:$0xf0] }
 0x2fe   :  { %v2124_v11 = vor.u32 %v2396_v8, %v2121_v9  ;;  %v2429_v8 = vld [vmem:[#allocation11 + $0xf8] sm:$0xff]  ;;  %v2428_v9 = vld [vmem:[#allocation11 + $0xf0] sm:$0xff] }
 0x301   :  { %1298 = vmatpush.bf16.msrb.mxu2 %v2156_v54  ;;  %v2420_v54 = vld [vmem:[#allocation8 + $0xf0] sm:$0xff] }
 0x305   :  { %1299 = vmatpush.bf16.msrb.mxu2 %v2148_v58  ;;  %v2417_v58 = vld [vmem:[#allocation8 + $0xd8] sm:$0xff] }
 0x309   :  { %1300 = vmatpush.bf16.msrb.mxu2 %v2140_v63 }
 0x369   :  { %v702_v41 = vpop.f32.mrf.mxu2 }
 0x36a   :  { %v703_v43 = vadd.f32 %v2459_v40, %v702_v41 }
 0x36c   :  { %v706_v45 = vmax.f32 %v703_v43, 0.0  ;;  %v2383_v43 = vld [vmem:[#allocation11 + $0x88] sm:$0xff] }
 0x36e   :  { %v707_v46 = vpack.c.bf16 %v706_v45, %v706_v45  ;;  %v2382_v45 = vld [vmem:[#allocation11 + $0x80] sm:$0xff] }
 0x370   :  { %786 = vmatmul.bf16.vlgmr.msrb.gmra.mxu3 %v707_v46  ;;  %v2151_v46 = vld [vmem:[#allocation13 + $0x170] sm:$0xf] }
 0x371   :  { %v704_v47 = vpop.f32.mrf.mxu2 }
 0x372   :  { %v2405_v47 = vld [vmem:[#allocation13 + $0x174] sm:$0xf0] }
 0x373   :  { %v2152_v50 = vor.u32 %v2405_v47, %v2151_v46 }
 0x375   :  { %1285 = vmatpush.bf16.msrb.mxu1 %v2152_v50 }
 0x379   :  { %1286 = vmatpush.bf16.msrb.mxu1 %v2144_v57  ;;  %v1199_v57 = vld [vmem:[#allocation14 + $0x4] sm:$0x3] }
 0x37a   :  { %v1201_v14 = vperm.slane %v1199_v57, 0  ;;  %v1202_v63 = vperm.slane %v1199_v57, 1 }
 0x37d   :  { %1287 = vmatpush.bf16.msrb.mxu1 %v2136_v62 }
 0x3f3   :  { %v787_v3 = vpop.f32.mrf.mxu3 }
 0x3f4   :  { %v788_v4 = vadd.f32 %v2460_v2, %v787_v3  ;;  %v2398_v2 = vld [vmem:[#allocation13 + $0x144] sm:$0xf]  ;;  %v2129_v3 = vld [vmem:[#allocation13 + $0x148] sm:$0xf0] }
 0x3f6   :  { %v791_v5 = vmax.f32 %v788_v4, 0.0  ;;  %v2128_v4 = vor.u32 %v2399_v1, %v2127_v0 }
 0x3f8   :  { %v792_v6 = vpack.c.bf16 %v791_v5, %v791_v5  ;;  %v2132_v5 = vor.u32 %v2398_v2, %v2129_v3  ;;  %1288 = vmatpush.bf16.msrb.mxu1 %v2128_v4 }
 0x3fa   :  { %905 = vmatmul.bf16.vlgmr.msra.gmra.mxu0 %v792_v6  ;;  %918 = vmatmul.bf16.vlgmr.msra.gmra.mxu1 %v792_v6  ;;  %v2119_v6 = vld [vmem:[#allocation13 + $0x130] sm:$0xf] }
 0x3fb   :  { %v789_v7 = vpop.f32.mrf.mxu3  ;;  %1301 = vmatpush.bf16.msrb.mxu2 %v2132_v5 }
 0x3fc   :  { %v2397_v7 = vld [vmem:[#allocation13 + $0x134] sm:$0xf0] }
 0x3fd   :  { %v2120_v10 = vor.u32 %v2397_v7, %v2119_v6  ;;  %v2415_v6 = vld [vmem:[#allocation8 + $0xc8] sm:$0xff]  ;;  %v2414_v7 = vld [vmem:[#allocation8 + $0xc0] sm:$0xff] }
 0x3ff   :  { %1289 = vmatpush.bf16.msrb.mxu1 %v2120_v10  ;;  %1302 = vmatpush.bf16.msrb.mxu2 %v2124_v11  ;;  %v2426_v10 = vld [vmem:[#allocation11 + $0xe0] sm:$0xff]  ;;  %v2425_v11 = vld [vmem:[#allocation11 + $0xd8] sm:$0xff] }
 0x403   :  { %1290 = vmatpush.bf16.msrb.mxu1 %v2112_v17  ;;  %1303 = vmatpush.bf16.msrb.mxu2 %v2116_v18 }
 0x477   :  { %v906_v21 = vpop.f32.mrf.mxu0  ;;  %v919_v22 = vpop.f32.mrf.mxu1 }
 0x478   :  { %v907_v24 = vadd.f32 %v906_v21, %v813_v19  ;;  %v920_v25 = vadd.f32 %v919_v22, %v814_v20  ;;  %v2462_v19 = vld [vmem:[#allocation10 + $0x2] ss:$0 sm:$0xff] }
 0x47a   :  { %v2810_v26 = vsub.f32 %v2800_v49, %v907_v24  ;;  %v2812_v27 = vadd.f32 %v920_v25, %v532_v23  ;;  %v2386_v49 = vld [vmem:[#allocation11 + $0xa0] sm:$0xff]  ;;  %v2103_v25 = vld [vmem:[#allocation13 + $0x110] sm:$0xf] }
 0x47b   :  { %1169 = vmatpush.bf16.msrb.mxu0 %v2386_v49  ;;  %v2096_v49 = vor.u32 %v2391_v42, %v2095_v32  ;;  %v2434_v32 = vld [vmem:[#allocation13 + $0x1c8] sm:$0xf0] }
 0x47c   :  { %v925_v28 = vpack.c.bf16 %v2810_v26, %v2810_v26 }
 0x47e   :  { %1004 = vmatmul.bf16.vlgmr.msra.gmra.mxu2 %v925_v28  ;;  %v2393_v28 = vld [vmem:[#allocation13 + $0x114] sm:$0xf0] }
 0x47f   :  { %v908_v29 = vpop.f32.mrf.mxu0  ;;  %v921_v44 = vpop.f32.mrf.mxu1  ;;  %1170 = vmatpush.bf16.msrb.mxu0 %v2385_v34  ;;  %v2097_v34 = vld [vmem:[#allocation13 + $0x108] sm:$0xf0] }
 0x480   :  { %v2392_v29 = vld [vmem:[#allocation13 + $0x114] sm:$0xf]  ;;  %v2104_v44 = vor.u32 %v2393_v28, %v2103_v25  ;;  %v2436_v25 = vld [vmem:[#allocation13 + $0x1e8] sm:$0xf0] }
 0x481   :  { %v2108_v31 = vor.u32 %v2392_v29, %v2105_v30  ;;  %v2276_v29 = vld [vmem:[#allocation13 + $0x1d4] sm:$0xf] }
 0x482   :  { %1291 = vmatpush.bf16.msrb.mxu1 %v2104_v44  ;;  %v2435_v44 = vld [vmem:[#allocation13 + $0x1d8] sm:$0xf0] }
 0x483   :  { %1171 = vmatpush.bf16.msrb.mxu0 %v2384_v35  ;;  %1304 = vmatpush.bf16.msrb.mxu2 %v2108_v31  ;;  %v2100_v35 = vor.u32 %v2390_v33, %v2097_v34  ;;  %v2277_v30 = vor.u32 %v2435_v44, %v2276_v29  ;;  %v2272_v31 = vld [vmem:[#allocation13 + $0x1c4] sm:$0xf]  ;;  %v2268_v33 = vld [vmem:[#allocation13 + $0x1b4] sm:$0xf] }
 0x484   :  { %v2273_v42 = vor.u32 %v2434_v32, %v2272_v31 }
 0x486   :  { %1292 = vmatpush.bf16.msrb.mxu1 %v2096_v49  ;;  %v2433_v49 = vld [vmem:[#allocation13 + $0x1b8] sm:$0xf0] }
 0x487   :  { %1172 = vmatpush.bf16.msrb.mxu0 %v2383_v43  ;;  %1305 = vmatpush.bf16.msrb.mxu2 %v2100_v35  ;;  %v2463_v43 = vld [vmem:[%s2836_s6 + $0x2] ss:$0 sm:$0xff]  ;;  %v2269_v34 = vor.u32 %v2433_v49, %v2268_v33  ;;  %v2264_v35 = vld [vmem:[#allocation13 + $0x1a4] sm:$0xf] }
 0x48a   :  { %1554 = vmatpush.bf16.msra.mxu1 %v2429_v8 }
 0x48b   :  { %1173 = vmatpush.bf16.msrb.mxu0 %v2382_v45 }
 0x48e   :  { %1555 = vmatpush.bf16.msra.mxu1 %v2428_v9 }
 0x48f   :  { %1469 = vmatpush.bf16.msra.mxu0 %v2421_v53  ;;  %v2466_v53 = vld [vmem:[%s2836_s6 + $0x3] ss:$0 sm:$0xff] }
 0x493   :  { %1470 = vmatpush.bf16.msra.mxu0 %v2420_v54 }
 0x497   :  { %1471 = vmatpush.bf16.msra.mxu0 %v2419_v55 }
 0x49b   :  { %1472 = vmatpush.bf16.msra.mxu0 %v2418_v56 }
 0x49f   :  { %1473 = vmatpush.bf16.msra.mxu0 %v2417_v58 }
 0x4a3   :  { %1474 = vmatpush.bf16.msra.mxu0 %v2416_v60 }
 0x4a7   :  { %1475 = vmatpush.bf16.msra.mxu0 %v2415_v6 }
 0x4ab   :  { %1476 = vmatpush.bf16.msra.mxu0 %v2414_v7 }
 0x501   :  { %v1005_v37 = vpop.f32.mrf.mxu2 }
 0x502   :  { %v1006_v38 = vadd.f32 %v2461_v36, %v1005_v37  ;;  %v2413_v36 = vld [vmem:[#allocation5 + $0xf8] sm:$0xff]  ;;  %v2412_v37 = vld [vmem:[#allocation5 + $0xf0] sm:$0xff] }
 0x503   :  { %1384 = vmatpush.bf16.msrb.mxu3 %v2413_v36  ;;  %v2432_v36 = vld [vmem:[#allocation13 + $0x1a8] sm:$0xf0] }
 0x504   :  { %v1009_v39 = vmax.f32 %v1006_v38, 0.0  ;;  %v2411_v38 = vld [vmem:[#allocation5 + $0xe8] sm:$0xff] }
 0x506   :  { %v1010_v40 = vpack.c.bf16 %v1009_v39, %v1009_v39  ;;  %v2410_v39 = vld [vmem:[#allocation5 + $0xe0] sm:$0xff] }
 0x507   :  { %1385 = vmatpush.bf16.msrb.mxu3 %v2412_v37  ;;  %v2265_v37 = vor.u32 %v2432_v36, %v2264_v35 }
 0x508   :  { %1089 = vmatmul.bf16.vlgmr.msra.gmra.mxu3 %v1010_v40  ;;  %v2409_v40 = vld [vmem:[#allocation5 + $0xd8] sm:$0xff] }
 0x509   :  { %v1007_v41 = vpop.f32.mrf.mxu2 }
 0x50a   :  { %v2408_v41 = vld [vmem:[#allocation5 + $0xd0] sm:$0xff] }
 0x50b   :  { %1386 = vmatpush.bf16.msrb.mxu3 %v2411_v38  ;;  %v2465_v38 = vld [vmem:[#allocation10 + $0x3] ss:$0 sm:$0xff] }
 0x50f   :  { %1387 = vmatpush.bf16.msrb.mxu3 %v2410_v39 }
 0x513   :  { %1388 = vmatpush.bf16.msrb.mxu3 %v2409_v40 }
 0x517   :  { %1389 = vmatpush.bf16.msrb.mxu3 %v2408_v41 }
 0x51b   :  { %1390 = vmatpush.bf16.msrb.mxu3 %v2407_v51  ;;  %v2430_v51 = vld [vmem:[#allocation13 + $0x188] sm:$0xf0] }
 0x51f   :  { %1391 = vmatpush.bf16.msrb.mxu3 %v2406_v52 }
 0x58b   :  { %v1090_v20 = vpop.f32.mrf.mxu3 }
 0x58c   :  { %v1091_v21 = vadd.f32 %v2462_v19, %v1090_v20  ;;  %v2423_v19 = vld [vmem:[#allocation11 + $0xc8] sm:$0xff]  ;;  %v2422_v20 = vld [vmem:[#allocation11 + $0xc0] sm:$0xff] }
 0x58e   :  { %v1094_v22 = vmax.f32 %v1091_v21, 0.0  ;;  %v2284_v21 = vld [vmem:[#allocation13 + $0x1f4] sm:$0xf] }
 0x590   :  { %v1095_v23 = vpack.c.bf16 %v1094_v22, %v1094_v22  ;;  %v2437_v22 = vld [vmem:[#allocation13 + $0x1f8] sm:$0xf0] }
 0x592   :  { %1174 = vmatmul.bf16.vlgmr.msrb.gmra.mxu0 %v1095_v23  ;;  %v2280_v23 = vld [vmem:[#allocation13 + $0x1e4] sm:$0xf] }
 0x593   :  { %v1092_v24 = vpop.f32.mrf.mxu3  ;;  %v2281_v28 = vor.u32 %v2436_v25, %v2280_v23 }
 0x594   :  { %v2285_v24 = vor.u32 %v2437_v22, %v2284_v21 }
 0x596   :  { %1639 = vmatpush.bf16.msra.mxu2 %v2285_v24 }
 0x59a   :  { %1640 = vmatpush.bf16.msra.mxu2 %v2281_v28 }
 0x59e   :  { %1641 = vmatpush.bf16.msra.mxu2 %v2277_v30 }
 0x5a2   :  { %1642 = vmatpush.bf16.msra.mxu2 %v2273_v42 }
 0x5a6   :  { %1643 = vmatpush.bf16.msra.mxu2 %v2269_v34 }
 0x5aa   :  { %1644 = vmatpush.bf16.msra.mxu2 %v2265_v37 }
 0x60f   :  { %v1175_v45 = vpop.f32.mrf.mxu0 }
 0x610   :  { %v1176_v46 = vadd.f32 %v2463_v43, %v1175_v45 }
 0x612   :  { %v1179_v47 = vmax.f32 %v1176_v46, 0.0  ;;  %v2260_v46 = vld [vmem:[#allocation13 + $0x194] sm:$0xf] }
 0x614   :  { %v1180_v48 = vpack.c.bf16 %v1179_v47, %v1179_v47  ;;  %v2431_v47 = vld [vmem:[#allocation13 + $0x198] sm:$0xf0] }
 0x616   :  { %1293 = vmatmul.bf16.vlgmr.msrb.gmra.mxu1 %v1180_v48  ;;  %1306 = vmatmul.bf16.vlgmr.msrb.gmra.mxu2 %v1180_v48  ;;  %v2261_v48 = vor.u32 %v2431_v47, %v2260_v46 }
 0x617   :  { %v1177_v50 = vpop.f32.mrf.mxu0 }
 0x618   :  { %1645 = vmatpush.bf16.msra.mxu2 %v2261_v48  ;;  %v2256_v50 = vld [vmem:[#allocation13 + $0x184] sm:$0xf] }
 0x619   :  { %v2257_v52 = vor.u32 %v2430_v51, %v2256_v50 }
 0x61c   :  { %1646 = vmatpush.bf16.msra.mxu2 %v2257_v52 }
 0x693   :  { %v1294_v59 = vpop.f32.mrf.mxu1 }
 0x694   :  { %v1295_v61 = vadd.f32 %v1294_v59, %v1201_v14  ;;  %v2467_v14 = vld [vmem:[#allocation14 + $0x7] ss:$0 sm:$0xff] }
 0x696   :  { %v1311_v62 = vsub.f32 %v2810_v26, %v1295_v61  ;;  %v2427_v26 = vld [vmem:[#allocation11 + $0xe8] sm:$0xff] }
 0x697   :  { %1556 = vmatpush.bf16.msra.mxu1 %v2427_v26 }
 0x698   :  { %v1313_v0 = vpack.c.bf16 %v1311_v62, %v1311_v62 }
 0x699   :  { %v1307_v1 = vpop.f32.mrf.mxu2 }
 0x69a   :  { %v1308_v2 = vadd.f32 %v1307_v1, %v1202_v63  ;;  %1392 = vmatmul.bf16.vlgmr.msrb.gmra.mxu3 %v1313_v0 }
 0x69b   :  { %v1296_v3 = vpop.f32.mrf.mxu1  ;;  %1557 = vmatpush.bf16.msra.mxu1 %v2426_v10 }
 0x69c   :  { %v2821_v4 = vadd.f32 %v1308_v2, %v2812_v27 }
 0x69f   :  { %1558 = vmatpush.bf16.msra.mxu1 %v2425_v11 }
 0x6a1   :  { %v1309_v5 = vpop.f32.mrf.mxu2 }
 0x6a3   :  { %1559 = vmatpush.bf16.msra.mxu1 %v2424_v12 }
 0x6a7   :  { %1560 = vmatpush.bf16.msra.mxu1 %v2423_v19 }
 0x6ab   :  { %1561 = vmatpush.bf16.msra.mxu1 %v2422_v20 }
 0x71d   :  { %v1393_v27 = vpop.f32.mrf.mxu3 }
 0x71e   :  { %v1394_v15 = vadd.f32 %v2464_v13, %v1393_v27 }
 0x720   :  { %v1397_v16 = vmax.f32 %v1394_v15, 0.0 }
 0x722   :  { %v1398_v17 = vpack.c.bf16 %v1397_v16, %v1397_v16 }
 0x724   :  { %1477 = vmatmul.bf16.vlgmr.msra.gmra.mxu0 %v1398_v17 }
 0x725   :  { %v1395_v18 = vpop.f32.mrf.mxu3 }
 0x7a1   :  { %v1478_v39 = vpop.f32.mrf.mxu0 }
 0x7a2   :  { %v1479_v40 = vadd.f32 %v2465_v38, %v1478_v39 }
 0x7a4   :  { %v1482_v41 = vmax.f32 %v1479_v40, 0.0 }
 0x7a6   :  { %v1483_v43 = vpack.c.bf16 %v1482_v41, %v1482_v41 }
 0x7a8   :  { %1562 = vmatmul.bf16.vlgmr.msra.gmra.mxu1 %v1483_v43 }
 0x7a9   :  { %v1480_v45 = vpop.f32.mrf.mxu0 }
 0x825   :  { %v1563_v54 = vpop.f32.mrf.mxu1 }
 0x826   :  { %v1564_v55 = vadd.f32 %v2466_v53, %v1563_v54 }
 0x828   :  { %v1567_v56 = vmax.f32 %v1564_v55, 0.0 }
 0x82a   :  { %v1568_v57 = vpack.c.bf16 %v1567_v56, %v1567_v56 }
 0x82c   :  { %1647 = vmatmul.bf16.vlgmr.msra.gmra.mxu2 %v1568_v57 }
 0x82d   :  { %v1565_v58 = vpop.f32.mrf.mxu1 }
 0x8af   :  { %v1648_v59 = vpop.f32.mrf.mxu2 }
 0x8b0   :  { %v1649_v60 = vadd.f32 %v2467_v14, %v1648_v59 }
 0x8b2   :  { %v1652_v61 = vadd.f32 %v1649_v60, %v2821_v4 }
 0x8b4   :  { %1653 = vst [vmem:[#allocation16] sm:$0xff] %v1652_v61 }
 0x8b5   :  { %1664 = dma.vmem_to_hbm [thread:$0]  %s1660_s13, 128, %s1662_s15, [#allocation4]  }
 0x8b7   :  { %v1650_v62 = vpop.f32.mrf.mxu2 }
 0x8b8   :  { %2694 = dma.done.wait [#allocation4], 128  }
 0x8b9   :  { %2695 = vsyncadd [#allocation4], 4294967168 }
 0x8ba   :  { %1669 = vsyncpa [#allocation3], 1 }
 0x8bb   :  { %1670 = vsyncpa [#allocation6], 1 }
 0x8bc   :  { %1671 = vsyncpa [#allocation9], 1 }
 0x8bd   :  { %1672 = vsyncpa [#allocation12], 1 }
 0x8be   :  { %1673 = vsyncpa [#allocation15], 1 }
 0x8bf   :  { %1674 = vsyncpa [#allocation4], 1 }

</bundles_post_ra>
